<compile_context>
chip_gen: v5e
topology: v5e:2x2
jax: 0.10.0
libtpu: 0.0.40
codegen_flags: <defaults>
</compile_context>

<pallas_src>
import math
from functools import partial

import jax
import jax.numpy as jnp
from jax.experimental import pallas as pl
from jax.experimental.pallas import tpu as pltpu

# ---- small synthetic config (consistent with a DETR-like encoder) ----
D_MODEL = 32
NHEAD = 4
DIM_FF = 64
NUM_LAYERS = 2
SEQ = 8
BATCH = 2
HEAD_DIM = D_MODEL // NHEAD
LN_EPS = 1e-5


def _layer_norm(x, gamma, beta):
    mu = jnp.mean(x, axis=-1, keepdims=True)
    var = jnp.mean((x - mu) ** 2, axis=-1, keepdims=True)
    return (x - mu) * jax.lax.rsqrt(var + LN_EPS) * gamma + beta


def encoder_stack_kernel(nhead, src_ref, pos_ref, w_qk_ref, b_qk_ref, w_v_ref,
                         b_v_ref, wo_ref, w1_ref, w2_ref, bd_ref, b1_ref, out_ref):
    """All encoder layers for one batch element (grid axis = batch, 'parallel').

    src_ref/pos_ref/out_ref: (1, S, D)
    w_qk_ref: (L, D, 2D) bf16   packed [Wq | Wk], lane-dense
    b_qk_ref: (L, 1, 2D) f32
    w_v_ref:  (L, D, D)  bf16   b_v_ref: (L, 1, D) f32
    wo_ref:   (L, D, D)  bf16   out-projection
    w1_ref:   (L, D, F)  bf16   w2_ref: (L, F, D) bf16   b1_ref: (L, 1, F) f32
    bd_ref:   (L, 6, D)  f32    rows = [bo, b2, gamma1, beta1, gamma2, beta2]
    """
    seq, d = src_ref.shape[1], src_ref.shape[2]
    num_layers = w_qk_ref.shape[0]
    head_dim = d // nhead
    scale = 1.0 / math.sqrt(head_dim)

    x0 = src_ref[0].astype(jnp.float32)        # (S, D)
    pos = pos_ref[0].astype(jnp.float32)       # (S, D)

    def layer_body(l, x):
        bd = bd_ref[l]                          # (6, D)
        bo, b2 = bd[0:1], bd[1:2]
        g1, be1 = bd[2:3], bd[3:4]
        g2, be2 = bd[4:5], bd[5:6]

        qk_in = x + pos                         # q = k = with_pos_embed(src, pos); value = src

        # ---- wide lane-dense projections: one (D,2D) matmul for [Q|K], one (D,D) for V ----
        qk = jnp.dot(qk_in.astype(jnp.bfloat16), w_qk_ref[l],
                     preferred_element_type=jnp.float32) + b_qk_ref[l]        # (S, 2D) f32
        v = jnp.dot(x.astype(jnp.bfloat16), w_v_ref[l],
                    preferred_element_type=jnp.float32) + b_v_ref[l]          # (S, D)  f32

        # heads viewed from the wide result (same column order as PyTorch head split)
        q3 = qk[:, :d].reshape(seq, nhead, head_dim).transpose(1, 0, 2).astype(jnp.bfloat16)
        k3 = qk[:, d:].reshape(seq, nhead, head_dim).transpose(1, 0, 2).astype(jnp.bfloat16)
        v3 = v.reshape(seq, nhead, head_dim).transpose(1, 0, 2).astype(jnp.bfloat16)

        # ---- head-batched attention: two einsums instead of a per-head Python loop ----
        s = jnp.einsum('hqd,hkd->hqk', q3, k3,
                       preferred_element_type=jnp.float32) * scale            # (H, S, S) f32
        s = s - jnp.max(s, axis=-1, keepdims=True)
        e = jnp.exp(s)
        p = e * pl.reciprocal(jnp.sum(e, axis=-1, keepdims=True), approx=True)
        o3 = jnp.einsum('hqk,hkd->hqd', p.astype(jnp.bfloat16), v3,
                        preferred_element_type=jnp.float32)                   # (H, S, HD)

        # concat heads (reshape) + single (D,D) out-projection
        o = o3.transpose(1, 0, 2).reshape(seq, d)
        attn = jnp.dot(o.astype(jnp.bfloat16), wo_ref[l],
                       preferred_element_type=jnp.float32) + bo

        # residual + LayerNorm1
        y = _layer_norm(x + attn, g1, be1)
        # feed-forward: Linear1 -> ReLU -> Linear2
        hid = jnp.maximum(jnp.dot(y.astype(jnp.bfloat16), w1_ref[l],
                                  preferred_element_type=jnp.float32) + b1_ref[l], 0.0)
        ffn = jnp.dot(hid.astype(jnp.bfloat16), w2_ref[l],
                      preferred_element_type=jnp.float32) + b2
        # residual + LayerNorm2
        return _layer_norm(y + ffn, g2, be2)

    x = jax.lax.fori_loop(0, num_layers, layer_body, x0, unroll=True)
    out_ref[0] = x.astype(out_ref.dtype)


def transformer_encoder(src_sbd, pos_sbd, params):
    """TransformerEncoder.forward with mask=None, src_key_padding_mask=None, norm=None.

    src_sbd, pos_sbd: (S, B, D) as in PyTorch nn.MultiheadAttention / DETR.
    """
    S, B, D = src_sbd.shape
    x_bsd = jnp.transpose(src_sbd, (1, 0, 2))   # (B, S, D)
    p_bsd = jnp.transpose(pos_sbd, (1, 0, 2))

    weights = (params["w_qk"], params["b_qk"], params["w_v"], params["b_v"],
               params["wo"], params["w1"], params["w2"], params["bd"], params["b1"])

    def resident(a):
        # whole array, constant block index across the grid -> stays VMEM-resident
        return pl.BlockSpec(a.shape, lambda b: (0,) * a.ndim)

    act_spec = pl.BlockSpec((1, S, D), lambda b: (b, 0, 0))

    out = pl.pallas_call(
        partial(encoder_stack_kernel, NHEAD),
        out_shape=jax.ShapeDtypeStruct((B, S, D), src_sbd.dtype),
        grid_spec=pltpu.PrefetchScalarGridSpec(
            num_scalar_prefetch=0,
            grid=(B,),                           # batch axis shards across v7x's two TCs
            in_specs=[act_spec, act_spec] + [resident(a) for a in weights],
            out_specs=act_spec,
        ),
        compiler_params=pltpu.CompilerParams(dimension_semantics=("parallel",)),
    )(x_bsd, p_bsd, *weights)

    # self.norm is None in this configuration -> identity; back to (S, B, D)
    return jnp.transpose(out, (1, 0, 2))


def init_params(key):
    """Random weights for all layers, stacked/packed lane-dense for the fused kernel."""
    L, D, F = NUM_LAYERS, D_MODEL, DIM_FF
    ks = jax.random.split(key, 12)
    s = 0.05

    def lin(kw, kb, din, dout):
        # pre-transposed to (in, out) so the kernel does x @ W
        w = s * jax.random.normal(kw, (L, din, dout), jnp.float32)
        b = s * jax.random.normal(kb, (L, dout), jnp.float32)
        return w, b

    wq, bq = lin(ks[0], ks[1], D, D)
    wk, bk = lin(ks[2], ks[3], D, D)
    wv, bv = lin(ks[4], ks[5], D, D)
    wo, bo = lin(ks[6], ks[7], D, D)
    w1, b1 = lin(ks[8], ks[9], D, F)
    w2, b2 = lin(ks[10], ks[11], F, D)
    g1 = jnp.ones((L, D), jnp.float32)
    be1 = jnp.zeros((L, D), jnp.float32)
    g2 = jnp.ones((L, D), jnp.float32)
    be2 = jnp.zeros((L, D), jnp.float32)

    # lane-dense packing; matmul weights stored bf16 (MXU-native on v6e/v7x, halves DMA
    # bytes); everything applied post-accumulation (biases, LN affine) stays f32.
    w_qk = jnp.concatenate([wq, wk], axis=-1).astype(jnp.bfloat16)        # (L, D, 2D)
    b_qk = jnp.concatenate([bq, bk], axis=-1).reshape(L, 1, 2 * D)         # (L, 1, 2D)
    bd = jnp.stack([bo, b2, g1, be1, g2, be2], axis=1)                     # (L, 6, D)

    return dict(w_qk=w_qk, b_qk=b_qk,
                w_v=wv.astype(jnp.bfloat16), b_v=bv.reshape(L, 1, D),
                wo=wo.astype(jnp.bfloat16),
                w1=w1.astype(jnp.bfloat16), w2=w2.astype(jnp.bfloat16),
                bd=bd, b1=b1.reshape(L, 1, F))


if __name__ == "__main__":
    key = jax.random.PRNGKey(0)
    k_src, k_pos, k_par = jax.random.split(key, 3)

    src = jax.random.normal(k_src, (SEQ, BATCH, D_MODEL), jnp.float32)
    pos = jax.random.normal(k_pos, (SEQ, BATCH, D_MODEL), jnp.float32)
    params = init_params(k_par)

    out = jax.jit(transformer_encoder)(src, pos, params)
    jax.block_until_ready(out)
    assert out.shape == (SEQ, BATCH, D_MODEL)
    print("KERNEL_OK")
</pallas_src>

<mosaic_0001>
module attributes {stable_mosaic.version = 11 : i64} {
  func.func @encoder_stack_kernel(%arg0: i32, %arg1: memref<1x8x32xf32, #tpu.memory_space<vmem>>, %arg2: memref<1x8x32xf32, #tpu.memory_space<vmem>>, %arg3: memref<2x32x64xbf16, #tpu.memory_space<vmem>>, %arg4: memref<2x1x64xf32, #tpu.memory_space<vmem>>, %arg5: memref<2x32x32xbf16, #tpu.memory_space<vmem>>, %arg6: memref<2x1x32xf32, #tpu.memory_space<vmem>>, %arg7: memref<2x32x32xbf16, #tpu.memory_space<vmem>>, %arg8: memref<2x32x64xbf16, #tpu.memory_space<vmem>>, %arg9: memref<2x64x32xbf16, #tpu.memory_space<vmem>>, %arg10: memref<2x6x32xf32, #tpu.memory_space<vmem>>, %arg11: memref<2x1x64xf32, #tpu.memory_space<vmem>>, %arg12: memref<1x8x32xf32, #tpu.memory_space<vmem>>) attributes {dimension_semantics = [#tpu.dimension_semantics<parallel>], iteration_bounds = array<i64: 2>, scalar_prefetch = 0 : i64, scratch_operands = 0 : i64, tpu.core_type = #tpu.core_type<tc>, window_params = [{transform_indices = @transform_0, window_bounds = array<i64: 1, 8, 32>}, {transform_indices = @transform_1, window_bounds = array<i64: 1, 8, 32>}, {pipeline_mode = #tpu.pipeline_mode<synchronous>, transform_indices = @transform_2, window_bounds = array<i64: 2, 32, 64>}, {pipeline_mode = #tpu.pipeline_mode<synchronous>, transform_indices = @transform_3, window_bounds = array<i64: 2, 1, 64>}, {pipeline_mode = #tpu.pipeline_mode<synchronous>, transform_indices = @transform_4, window_bounds = array<i64: 2, 32, 32>}, {pipeline_mode = #tpu.pipeline_mode<synchronous>, transform_indices = @transform_5, window_bounds = array<i64: 2, 1, 32>}, {pipeline_mode = #tpu.pipeline_mode<synchronous>, transform_indices = @transform_6, window_bounds = array<i64: 2, 32, 32>}, {pipeline_mode = #tpu.pipeline_mode<synchronous>, transform_indices = @transform_7, window_bounds = array<i64: 2, 32, 64>}, {pipeline_mode = #tpu.pipeline_mode<synchronous>, transform_indices = @transform_8, window_bounds = array<i64: 2, 64, 32>}, {pipeline_mode = #tpu.pipeline_mode<synchronous>, transform_indices = @transform_9, window_bounds = array<i64: 2, 6, 32>}, {pipeline_mode = #tpu.pipeline_mode<synchronous>, transform_indices = @transform_10, window_bounds = array<i64: 2, 1, 64>}, {transform_indices = @transform_11, window_bounds = array<i64: 1, 8, 32>}]} {
    %c0 = arith.constant 0 : index
    %c0_0 = arith.constant 0 : index
    %c0_1 = arith.constant 0 : index
    %0 = vector.load %arg1[%c0, %c0_0, %c0_1] : memref<1x8x32xf32, #tpu.memory_space<vmem>>, vector<1x8x32xf32>
    %1 = vector.shape_cast %0 : vector<1x8x32xf32> to vector<8x32xf32>
    %c0_2 = arith.constant 0 : index
    %c0_3 = arith.constant 0 : index
    %c0_4 = arith.constant 0 : index
    %2 = vector.load %arg2[%c0_2, %c0_3, %c0_4] : memref<1x8x32xf32, #tpu.memory_space<vmem>>, vector<1x8x32xf32>
    %3 = vector.shape_cast %2 : vector<1x8x32xf32> to vector<8x32xf32>
    %c0_i32 = arith.constant 0 : i32
    %4 = arith.index_cast %c0_i32 : i32 to index
    %c0_5 = arith.constant 0 : index
    %c0_6 = arith.constant 0 : index
    %5 = vector.load %arg10[%4, %c0_5, %c0_6] : memref<2x6x32xf32, #tpu.memory_space<vmem>>, vector<1x6x32xf32>
    %6 = vector.shape_cast %5 : vector<1x6x32xf32> to vector<6x32xf32>
    %7 = vector.extract_strided_slice %6 {offsets = [0, 0], sizes = [1, 32], strides = [1, 1]} : vector<6x32xf32> to vector<1x32xf32>
    %8 = vector.extract_strided_slice %6 {offsets = [1, 0], sizes = [1, 32], strides = [1, 1]} : vector<6x32xf32> to vector<1x32xf32>
    %9 = vector.extract_strided_slice %6 {offsets = [2, 0], sizes = [1, 32], strides = [1, 1]} : vector<6x32xf32> to vector<1x32xf32>
    %10 = vector.extract_strided_slice %6 {offsets = [3, 0], sizes = [1, 32], strides = [1, 1]} : vector<6x32xf32> to vector<1x32xf32>
    %11 = vector.extract_strided_slice %6 {offsets = [4, 0], sizes = [1, 32], strides = [1, 1]} : vector<6x32xf32> to vector<1x32xf32>
    %12 = vector.extract_strided_slice %6 {offsets = [5, 0], sizes = [1, 32], strides = [1, 1]} : vector<6x32xf32> to vector<1x32xf32>
    %13 = arith.addf %1, %3 : vector<8x32xf32>
    %14 = arith.truncf %13 : vector<8x32xf32> to vector<8x32xbf16>
    %15 = arith.index_cast %c0_i32 : i32 to index
    %c0_7 = arith.constant 0 : index
    %c0_8 = arith.constant 0 : index
    %16 = vector.load %arg3[%15, %c0_7, %c0_8] : memref<2x32x64xbf16, #tpu.memory_space<vmem>>, vector<1x32x64xbf16>
    %17 = vector.shape_cast %16 : vector<1x32x64xbf16> to vector<32x64xbf16>
    %cst = arith.constant dense<0.000000e+00> : vector<8x64xf32>
    %18 = tpu.matmul %14, %17, %cst {dimension_numbers = #tpu.dot_dimension_numbers<[1], [0], [0], [1], [0, 0, 1, 1], [], []>} : vector<8x32xbf16>, vector<32x64xbf16>, vector<8x64xf32> -> vector<8x64xf32>
    %19 = arith.index_cast %c0_i32 : i32 to index
    %c0_9 = arith.constant 0 : index
    %c0_10 = arith.constant 0 : index
    %20 = vector.load %arg4[%19, %c0_9, %c0_10] : memref<2x1x64xf32, #tpu.memory_space<vmem>>, vector<1x1x64xf32>
    %21 = vector.shape_cast %20 : vector<1x1x64xf32> to vector<1x64xf32>
    %22 = vector.broadcast %21 : vector<1x64xf32> to vector<8x64xf32>
    %23 = arith.addf %18, %22 : vector<8x64xf32>
    %24 = arith.truncf %1 : vector<8x32xf32> to vector<8x32xbf16>
    %25 = arith.index_cast %c0_i32 : i32 to index
    %c0_11 = arith.constant 0 : index
    %c0_12 = arith.constant 0 : index
    %26 = vector.load %arg5[%25, %c0_11, %c0_12] : memref<2x32x32xbf16, #tpu.memory_space<vmem>>, vector<1x32x32xbf16>
    %27 = vector.shape_cast %26 : vector<1x32x32xbf16> to vector<32x32xbf16>
    %cst_13 = arith.constant dense<0.000000e+00> : vector<8x32xf32>
    %28 = tpu.matmul %24, %27, %cst_13 {dimension_numbers = #tpu.dot_dimension_numbers<[1], [0], [0], [1], [0, 0, 1, 1], [], []>} : vector<8x32xbf16>, vector<32x32xbf16>, vector<8x32xf32> -> vector<8x32xf32>
    %29 = arith.index_cast %c0_i32 : i32 to index
    %c0_14 = arith.constant 0 : index
    %c0_15 = arith.constant 0 : index
    %30 = vector.load %arg6[%29, %c0_14, %c0_15] : memref<2x1x32xf32, #tpu.memory_space<vmem>>, vector<1x1x32xf32>
    %31 = vector.shape_cast %30 : vector<1x1x32xf32> to vector<1x32xf32>
    %32 = vector.broadcast %31 : vector<1x32xf32> to vector<8x32xf32>
    %33 = arith.addf %28, %32 : vector<8x32xf32>
    %34 = vector.extract_strided_slice %23 {offsets = [0, 0], sizes = [8, 32], strides = [1, 1]} : vector<8x64xf32> to vector<8x32xf32>
    %35 = vector.shape_cast %34 : vector<8x32xf32> to vector<8x4x8xf32>
    %36 = tpu.transpose %35, [1, 0, 2] : vector<8x4x8xf32> -> vector<4x8x8xf32>
    %37 = arith.truncf %36 : vector<4x8x8xf32> to vector<4x8x8xbf16>
    %38 = vector.extract_strided_slice %23 {offsets = [0, 32], sizes = [8, 32], strides = [1, 1]} : vector<8x64xf32> to vector<8x32xf32>
    %39 = vector.shape_cast %38 : vector<8x32xf32> to vector<8x4x8xf32>
    %40 = tpu.transpose %39, [1, 0, 2] : vector<8x4x8xf32> -> vector<4x8x8xf32>
    %41 = arith.truncf %40 : vector<4x8x8xf32> to vector<4x8x8xbf16>
    %42 = vector.shape_cast %33 : vector<8x32xf32> to vector<8x4x8xf32>
    %43 = tpu.transpose %42, [1, 0, 2] : vector<8x4x8xf32> -> vector<4x8x8xf32>
    %44 = arith.truncf %43 : vector<4x8x8xf32> to vector<4x8x8xbf16>
    "tpu.trace_start"() <{level = 10 : i32, message = "hqd,hkd->hqk"}> : () -> ()
    %cst_16 = arith.constant dense<0.000000e+00> : vector<4x8x8xf32>
    %45 = tpu.matmul %37, %41, %cst_16 {dimension_numbers = #tpu.dot_dimension_numbers<[2], [2], [1], [1], [0, 0, 0, 1, 1, 1], [0], [0]>} : vector<4x8x8xbf16>, vector<4x8x8xbf16>, vector<4x8x8xf32> -> vector<4x8x8xf32>
    "tpu.trace_stop"() : () -> ()
    %cst_17 = arith.constant 0.353553385 : f32
    %46 = vector.broadcast %cst_17 : f32 to vector<4x8x8xf32>
    %47 = arith.mulf %45, %46 : vector<4x8x8xf32>
    %cst_18 = arith.constant dense<0xFF800000> : vector<4x8xf32>
    %48 = vector.multi_reduction <maximumf>, %47, %cst_18 [2] : vector<4x8x8xf32> to vector<4x8xf32>
    %49 = vector.shape_cast %48 : vector<4x8xf32> to vector<4x8x1xf32>
    %50 = vector.broadcast %49 : vector<4x8x1xf32> to vector<4x8x8xf32>
    %51 = arith.subf %47, %50 : vector<4x8x8xf32>
    %52 = math.exp %51 : vector<4x8x8xf32>
    %cst_19 = arith.constant dense<0.000000e+00> : vector<4x8xf32>
    %53 = vector.multi_reduction <add>, %52, %cst_19 [2] : vector<4x8x8xf32> to vector<4x8xf32>
    %54 = vector.shape_cast %53 : vector<4x8xf32> to vector<4x8x1xf32>
    %55 = tpu.reciprocal %54 {approx = true} : vector<4x8x1xf32> -> vector<4x8x1xf32>
    %56 = vector.broadcast %55 : vector<4x8x1xf32> to vector<4x8x8xf32>
    %57 = arith.mulf %52, %56 : vector<4x8x8xf32>
    %58 = arith.truncf %57 : vector<4x8x8xf32> to vector<4x8x8xbf16>
    "tpu.trace_start"() <{level = 10 : i32, message = "hqk,hkd->hqd"}> : () -> ()
    %cst_20 = arith.constant dense<0.000000e+00> : vector<4x8x8xf32>
    %59 = tpu.matmul %58, %44, %cst_20 {dimension_numbers = #tpu.dot_dimension_numbers<[2], [1], [1], [2], [0, 0, 0, 1, 1, 2], [0], [0]>} : vector<4x8x8xbf16>, vector<4x8x8xbf16>, vector<4x8x8xf32> -> vector<4x8x8xf32>
    "tpu.trace_stop"() : () -> ()
    %60 = tpu.transpose %59, [1, 0, 2] : vector<4x8x8xf32> -> vector<8x4x8xf32>
    %61 = vector.shape_cast %60 : vector<8x4x8xf32> to vector<8x32xf32>
    %62 = arith.truncf %61 : vector<8x32xf32> to vector<8x32xbf16>
    %63 = arith.index_cast %c0_i32 : i32 to index
    %c0_21 = arith.constant 0 : index
    %c0_22 = arith.constant 0 : index
    %64 = vector.load %arg7[%63, %c0_21, %c0_22] : memref<2x32x32xbf16, #tpu.memory_space<vmem>>, vector<1x32x32xbf16>
    %65 = vector.shape_cast %64 : vector<1x32x32xbf16> to vector<32x32xbf16>
    %cst_23 = arith.constant dense<0.000000e+00> : vector<8x32xf32>
    %66 = tpu.matmul %62, %65, %cst_23 {dimension_numbers = #tpu.dot_dimension_numbers<[1], [0], [0], [1], [0, 0, 1, 1], [], []>} : vector<8x32xbf16>, vector<32x32xbf16>, vector<8x32xf32> -> vector<8x32xf32>
    %67 = vector.broadcast %7 : vector<1x32xf32> to vector<8x32xf32>
    %68 = arith.addf %66, %67 : vector<8x32xf32>
    %69 = arith.addf %1, %68 : vector<8x32xf32>
    %cst_24 = arith.constant dense<0.000000e+00> : vector<8xf32>
    %70 = vector.multi_reduction <add>, %69, %cst_24 [1] : vector<8x32xf32> to vector<8xf32>
    %71 = vector.shape_cast %70 : vector<8xf32> to vector<8x1xf32>
    %cst_25 = arith.constant 3.200000e+01 : f32
    %72 = vector.broadcast %cst_25 : f32 to vector<8x1xf32>
    %73 = arith.divf %71, %72 : vector<8x1xf32>
    %74 = vector.broadcast %73 : vector<8x1xf32> to vector<8x32xf32>
    %75 = arith.subf %69, %74 : vector<8x32xf32>
    %76 = arith.mulf %75, %75 : vector<8x32xf32>
    %cst_26 = arith.constant dense<0.000000e+00> : vector<8xf32>
    %77 = vector.multi_reduction <add>, %76, %cst_26 [1] : vector<8x32xf32> to vector<8xf32>
    %78 = vector.shape_cast %77 : vector<8xf32> to vector<8x1xf32>
    %cst_27 = arith.constant 3.200000e+01 : f32
    %79 = vector.broadcast %cst_27 : f32 to vector<8x1xf32>
    %80 = arith.divf %78, %79 : vector<8x1xf32>
    %81 = vector.broadcast %73 : vector<8x1xf32> to vector<8x32xf32>
    %82 = arith.subf %69, %81 : vector<8x32xf32>
    %cst_28 = arith.constant 9.99999974E-6 : f32
    %83 = vector.broadcast %cst_28 : f32 to vector<8x1xf32>
    %84 = arith.addf %80, %83 : vector<8x1xf32>
    %85 = math.rsqrt %84 : vector<8x1xf32>
    %86 = vector.broadcast %85 : vector<8x1xf32> to vector<8x32xf32>
    %87 = arith.mulf %82, %86 : vector<8x32xf32>
    %88 = vector.broadcast %9 : vector<1x32xf32> to vector<8x32xf32>
    %89 = arith.mulf %87, %88 : vector<8x32xf32>
    %90 = vector.broadcast %10 : vector<1x32xf32> to vector<8x32xf32>
    %91 = arith.addf %89, %90 : vector<8x32xf32>
    %92 = arith.truncf %91 : vector<8x32xf32> to vector<8x32xbf16>
    %93 = arith.index_cast %c0_i32 : i32 to index
    %c0_29 = arith.constant 0 : index
    %c0_30 = arith.constant 0 : index
    %94 = vector.load %arg8[%93, %c0_29, %c0_30] : memref<2x32x64xbf16, #tpu.memory_space<vmem>>, vector<1x32x64xbf16>
    %95 = vector.shape_cast %94 : vector<1x32x64xbf16> to vector<32x64xbf16>
    %cst_31 = arith.constant dense<0.000000e+00> : vector<8x64xf32>
    %96 = tpu.matmul %92, %95, %cst_31 {dimension_numbers = #tpu.dot_dimension_numbers<[1], [0], [0], [1], [0, 0, 1, 1], [], []>} : vector<8x32xbf16>, vector<32x64xbf16>, vector<8x64xf32> -> vector<8x64xf32>
    %97 = arith.index_cast %c0_i32 : i32 to index
    %c0_32 = arith.constant 0 : index
    %c0_33 = arith.constant 0 : index
    %98 = vector.load %arg11[%97, %c0_32, %c0_33] : memref<2x1x64xf32, #tpu.memory_space<vmem>>, vector<1x1x64xf32>
    %99 = vector.shape_cast %98 : vector<1x1x64xf32> to vector<1x64xf32>
    %100 = vector.broadcast %99 : vector<1x64xf32> to vector<8x64xf32>
    %101 = arith.addf %96, %100 : vector<8x64xf32>
    %cst_34 = arith.constant 0.000000e+00 : f32
    %102 = vector.broadcast %cst_34 : f32 to vector<8x64xf32>
    %103 = arith.maximumf %101, %102 : vector<8x64xf32>
    %104 = arith.truncf %103 : vector<8x64xf32> to vector<8x64xbf16>
    %105 = arith.index_cast %c0_i32 : i32 to index
    %c0_35 = arith.constant 0 : index
    %c0_36 = arith.constant 0 : index
    %106 = vector.load %arg9[%105, %c0_35, %c0_36] : memref<2x64x32xbf16, #tpu.memory_space<vmem>>, vector<1x64x32xbf16>
    %107 = vector.shape_cast %106 : vector<1x64x32xbf16> to vector<64x32xbf16>
    %cst_37 = arith.constant dense<0.000000e+00> : vector<8x32xf32>
    %108 = tpu.matmul %104, %107, %cst_37 {dimension_numbers = #tpu.dot_dimension_numbers<[1], [0], [0], [1], [0, 0, 1, 1], [], []>} : vector<8x64xbf16>, vector<64x32xbf16>, vector<8x32xf32> -> vector<8x32xf32>
    %109 = vector.broadcast %8 : vector<1x32xf32> to vector<8x32xf32>
    %110 = arith.addf %108, %109 : vector<8x32xf32>
    %111 = arith.addf %91, %110 : vector<8x32xf32>
    %cst_38 = arith.constant dense<0.000000e+00> : vector<8xf32>
    %112 = vector.multi_reduction <add>, %111, %cst_38 [1] : vector<8x32xf32> to vector<8xf32>
    %113 = vector.shape_cast %112 : vector<8xf32> to vector<8x1xf32>
    %cst_39 = arith.constant 3.200000e+01 : f32
    %114 = vector.broadcast %cst_39 : f32 to vector<8x1xf32>
    %115 = arith.divf %113, %114 : vector<8x1xf32>
    %116 = vector.broadcast %115 : vector<8x1xf32> to vector<8x32xf32>
    %117 = arith.subf %111, %116 : vector<8x32xf32>
    %118 = arith.mulf %117, %117 : vector<8x32xf32>
    %cst_40 = arith.constant dense<0.000000e+00> : vector<8xf32>
    %119 = vector.multi_reduction <add>, %118, %cst_40 [1] : vector<8x32xf32> to vector<8xf32>
    %120 = vector.shape_cast %119 : vector<8xf32> to vector<8x1xf32>
    %cst_41 = arith.constant 3.200000e+01 : f32
    %121 = vector.broadcast %cst_41 : f32 to vector<8x1xf32>
    %122 = arith.divf %120, %121 : vector<8x1xf32>
    %123 = vector.broadcast %115 : vector<8x1xf32> to vector<8x32xf32>
    %124 = arith.subf %111, %123 : vector<8x32xf32>
    %cst_42 = arith.constant 9.99999974E-6 : f32
    %125 = vector.broadcast %cst_42 : f32 to vector<8x1xf32>
    %126 = arith.addf %122, %125 : vector<8x1xf32>
    %127 = math.rsqrt %126 : vector<8x1xf32>
    %128 = vector.broadcast %127 : vector<8x1xf32> to vector<8x32xf32>
    %129 = arith.mulf %124, %128 : vector<8x32xf32>
    %130 = vector.broadcast %11 : vector<1x32xf32> to vector<8x32xf32>
    %131 = arith.mulf %129, %130 : vector<8x32xf32>
    %132 = vector.broadcast %12 : vector<1x32xf32> to vector<8x32xf32>
    %133 = arith.addf %131, %132 : vector<8x32xf32>
    %c1_i32 = arith.constant 1 : i32
    %134 = arith.index_cast %c1_i32 : i32 to index
    %c0_43 = arith.constant 0 : index
    %c0_44 = arith.constant 0 : index
    %135 = vector.load %arg10[%134, %c0_43, %c0_44] : memref<2x6x32xf32, #tpu.memory_space<vmem>>, vector<1x6x32xf32>
    %136 = vector.shape_cast %135 : vector<1x6x32xf32> to vector<6x32xf32>
    %137 = vector.extract_strided_slice %136 {offsets = [0, 0], sizes = [1, 32], strides = [1, 1]} : vector<6x32xf32> to vector<1x32xf32>
    %138 = vector.extract_strided_slice %136 {offsets = [1, 0], sizes = [1, 32], strides = [1, 1]} : vector<6x32xf32> to vector<1x32xf32>
    %139 = vector.extract_strided_slice %136 {offsets = [2, 0], sizes = [1, 32], strides = [1, 1]} : vector<6x32xf32> to vector<1x32xf32>
    %140 = vector.extract_strided_slice %136 {offsets = [3, 0], sizes = [1, 32], strides = [1, 1]} : vector<6x32xf32> to vector<1x32xf32>
    %141 = vector.extract_strided_slice %136 {offsets = [4, 0], sizes = [1, 32], strides = [1, 1]} : vector<6x32xf32> to vector<1x32xf32>
    %142 = vector.extract_strided_slice %136 {offsets = [5, 0], sizes = [1, 32], strides = [1, 1]} : vector<6x32xf32> to vector<1x32xf32>
    %143 = arith.addf %133, %3 : vector<8x32xf32>
    %144 = arith.truncf %143 : vector<8x32xf32> to vector<8x32xbf16>
    %145 = arith.index_cast %c1_i32 : i32 to index
    %c0_45 = arith.constant 0 : index
    %c0_46 = arith.constant 0 : index
    %146 = vector.load %arg3[%145, %c0_45, %c0_46] : memref<2x32x64xbf16, #tpu.memory_space<vmem>>, vector<1x32x64xbf16>
    %147 = vector.shape_cast %146 : vector<1x32x64xbf16> to vector<32x64xbf16>
    %cst_47 = arith.constant dense<0.000000e+00> : vector<8x64xf32>
    %148 = tpu.matmul %144, %147, %cst_47 {dimension_numbers = #tpu.dot_dimension_numbers<[1], [0], [0], [1], [0, 0, 1, 1], [], []>} : vector<8x32xbf16>, vector<32x64xbf16>, vector<8x64xf32> -> vector<8x64xf32>
    %149 = arith.index_cast %c1_i32 : i32 to index
    %c0_48 = arith.constant 0 : index
    %c0_49 = arith.constant 0 : index
    %150 = vector.load %arg4[%149, %c0_48, %c0_49] : memref<2x1x64xf32, #tpu.memory_space<vmem>>, vector<1x1x64xf32>
    %151 = vector.shape_cast %150 : vector<1x1x64xf32> to vector<1x64xf32>
    %152 = vector.broadcast %151 : vector<1x64xf32> to vector<8x64xf32>
    %153 = arith.addf %148, %152 : vector<8x64xf32>
    %154 = arith.truncf %133 : vector<8x32xf32> to vector<8x32xbf16>
    %155 = arith.index_cast %c1_i32 : i32 to index
    %c0_50 = arith.constant 0 : index
    %c0_51 = arith.constant 0 : index
    %156 = vector.load %arg5[%155, %c0_50, %c0_51] : memref<2x32x32xbf16, #tpu.memory_space<vmem>>, vector<1x32x32xbf16>
    %157 = vector.shape_cast %156 : vector<1x32x32xbf16> to vector<32x32xbf16>
    %cst_52 = arith.constant dense<0.000000e+00> : vector<8x32xf32>
    %158 = tpu.matmul %154, %157, %cst_52 {dimension_numbers = #tpu.dot_dimension_numbers<[1], [0], [0], [1], [0, 0, 1, 1], [], []>} : vector<8x32xbf16>, vector<32x32xbf16>, vector<8x32xf32> -> vector<8x32xf32>
    %159 = arith.index_cast %c1_i32 : i32 to index
    %c0_53 = arith.constant 0 : index
    %c0_54 = arith.constant 0 : index
    %160 = vector.load %arg6[%159, %c0_53, %c0_54] : memref<2x1x32xf32, #tpu.memory_space<vmem>>, vector<1x1x32xf32>
    %161 = vector.shape_cast %160 : vector<1x1x32xf32> to vector<1x32xf32>
    %162 = vector.broadcast %161 : vector<1x32xf32> to vector<8x32xf32>
    %163 = arith.addf %158, %162 : vector<8x32xf32>
    %164 = vector.extract_strided_slice %153 {offsets = [0, 0], sizes = [8, 32], strides = [1, 1]} : vector<8x64xf32> to vector<8x32xf32>
    %165 = vector.shape_cast %164 : vector<8x32xf32> to vector<8x4x8xf32>
    %166 = tpu.transpose %165, [1, 0, 2] : vector<8x4x8xf32> -> vector<4x8x8xf32>
    %167 = arith.truncf %166 : vector<4x8x8xf32> to vector<4x8x8xbf16>
    %168 = vector.extract_strided_slice %153 {offsets = [0, 32], sizes = [8, 32], strides = [1, 1]} : vector<8x64xf32> to vector<8x32xf32>
    %169 = vector.shape_cast %168 : vector<8x32xf32> to vector<8x4x8xf32>
    %170 = tpu.transpose %169, [1, 0, 2] : vector<8x4x8xf32> -> vector<4x8x8xf32>
    %171 = arith.truncf %170 : vector<4x8x8xf32> to vector<4x8x8xbf16>
    %172 = vector.shape_cast %163 : vector<8x32xf32> to vector<8x4x8xf32>
    %173 = tpu.transpose %172, [1, 0, 2] : vector<8x4x8xf32> -> vector<4x8x8xf32>
    %174 = arith.truncf %173 : vector<4x8x8xf32> to vector<4x8x8xbf16>
    "tpu.trace_start"() <{level = 10 : i32, message = "hqd,hkd->hqk"}> : () -> ()
    %cst_55 = arith.constant dense<0.000000e+00> : vector<4x8x8xf32>
    %175 = tpu.matmul %167, %171, %cst_55 {dimension_numbers = #tpu.dot_dimension_numbers<[2], [2], [1], [1], [0, 0, 0, 1, 1, 1], [0], [0]>} : vector<4x8x8xbf16>, vector<4x8x8xbf16>, vector<4x8x8xf32> -> vector<4x8x8xf32>
    "tpu.trace_stop"() : () -> ()
    %cst_56 = arith.constant 0.353553385 : f32
    %176 = vector.broadcast %cst_56 : f32 to vector<4x8x8xf32>
    %177 = arith.mulf %175, %176 : vector<4x8x8xf32>
    %cst_57 = arith.constant dense<0xFF800000> : vector<4x8xf32>
    %178 = vector.multi_reduction <maximumf>, %177, %cst_57 [2] : vector<4x8x8xf32> to vector<4x8xf32>
    %179 = vector.shape_cast %178 : vector<4x8xf32> to vector<4x8x1xf32>
    %180 = vector.broadcast %179 : vector<4x8x1xf32> to vector<4x8x8xf32>
    %181 = arith.subf %177, %180 : vector<4x8x8xf32>
    %182 = math.exp %181 : vector<4x8x8xf32>
    %cst_58 = arith.constant dense<0.000000e+00> : vector<4x8xf32>
    %183 = vector.multi_reduction <add>, %182, %cst_58 [2] : vector<4x8x8xf32> to vector<4x8xf32>
    %184 = vector.shape_cast %183 : vector<4x8xf32> to vector<4x8x1xf32>
    %185 = tpu.reciprocal %184 {approx = true} : vector<4x8x1xf32> -> vector<4x8x1xf32>
    %186 = vector.broadcast %185 : vector<4x8x1xf32> to vector<4x8x8xf32>
    %187 = arith.mulf %182, %186 : vector<4x8x8xf32>
    %188 = arith.truncf %187 : vector<4x8x8xf32> to vector<4x8x8xbf16>
    "tpu.trace_start"() <{level = 10 : i32, message = "hqk,hkd->hqd"}> : () -> ()
    %cst_59 = arith.constant dense<0.000000e+00> : vector<4x8x8xf32>
    %189 = tpu.matmul %188, %174, %cst_59 {dimension_numbers = #tpu.dot_dimension_numbers<[2], [1], [1], [2], [0, 0, 0, 1, 1, 2], [0], [0]>} : vector<4x8x8xbf16>, vector<4x8x8xbf16>, vector<4x8x8xf32> -> vector<4x8x8xf32>
    "tpu.trace_stop"() : () -> ()
    %190 = tpu.transpose %189, [1, 0, 2] : vector<4x8x8xf32> -> vector<8x4x8xf32>
    %191 = vector.shape_cast %190 : vector<8x4x8xf32> to vector<8x32xf32>
    %192 = arith.truncf %191 : vector<8x32xf32> to vector<8x32xbf16>
    %193 = arith.index_cast %c1_i32 : i32 to index
    %c0_60 = arith.constant 0 : index
    %c0_61 = arith.constant 0 : index
    %194 = vector.load %arg7[%193, %c0_60, %c0_61] : memref<2x32x32xbf16, #tpu.memory_space<vmem>>, vector<1x32x32xbf16>
    %195 = vector.shape_cast %194 : vector<1x32x32xbf16> to vector<32x32xbf16>
    %cst_62 = arith.constant dense<0.000000e+00> : vector<8x32xf32>
    %196 = tpu.matmul %192, %195, %cst_62 {dimension_numbers = #tpu.dot_dimension_numbers<[1], [0], [0], [1], [0, 0, 1, 1], [], []>} : vector<8x32xbf16>, vector<32x32xbf16>, vector<8x32xf32> -> vector<8x32xf32>
    %197 = vector.broadcast %137 : vector<1x32xf32> to vector<8x32xf32>
    %198 = arith.addf %196, %197 : vector<8x32xf32>
    %199 = arith.addf %133, %198 : vector<8x32xf32>
    %cst_63 = arith.constant dense<0.000000e+00> : vector<8xf32>
    %200 = vector.multi_reduction <add>, %199, %cst_63 [1] : vector<8x32xf32> to vector<8xf32>
    %201 = vector.shape_cast %200 : vector<8xf32> to vector<8x1xf32>
    %cst_64 = arith.constant 3.200000e+01 : f32
    %202 = vector.broadcast %cst_64 : f32 to vector<8x1xf32>
    %203 = arith.divf %201, %202 : vector<8x1xf32>
    %204 = vector.broadcast %203 : vector<8x1xf32> to vector<8x32xf32>
    %205 = arith.subf %199, %204 : vector<8x32xf32>
    %206 = arith.mulf %205, %205 : vector<8x32xf32>
    %cst_65 = arith.constant dense<0.000000e+00> : vector<8xf32>
    %207 = vector.multi_reduction <add>, %206, %cst_65 [1] : vector<8x32xf32> to vector<8xf32>
    %208 = vector.shape_cast %207 : vector<8xf32> to vector<8x1xf32>
    %cst_66 = arith.constant 3.200000e+01 : f32
    %209 = vector.broadcast %cst_66 : f32 to vector<8x1xf32>
    %210 = arith.divf %208, %209 : vector<8x1xf32>
    %211 = vector.broadcast %203 : vector<8x1xf32> to vector<8x32xf32>
    %212 = arith.subf %199, %211 : vector<8x32xf32>
    %cst_67 = arith.constant 9.99999974E-6 : f32
    %213 = vector.broadcast %cst_67 : f32 to vector<8x1xf32>
    %214 = arith.addf %210, %213 : vector<8x1xf32>
    %215 = math.rsqrt %214 : vector<8x1xf32>
    %216 = vector.broadcast %215 : vector<8x1xf32> to vector<8x32xf32>
    %217 = arith.mulf %212, %216 : vector<8x32xf32>
    %218 = vector.broadcast %139 : vector<1x32xf32> to vector<8x32xf32>
    %219 = arith.mulf %217, %218 : vector<8x32xf32>
    %220 = vector.broadcast %140 : vector<1x32xf32> to vector<8x32xf32>
    %221 = arith.addf %219, %220 : vector<8x32xf32>
    %222 = arith.truncf %221 : vector<8x32xf32> to vector<8x32xbf16>
    %223 = arith.index_cast %c1_i32 : i32 to index
    %c0_68 = arith.constant 0 : index
    %c0_69 = arith.constant 0 : index
    %224 = vector.load %arg8[%223, %c0_68, %c0_69] : memref<2x32x64xbf16, #tpu.memory_space<vmem>>, vector<1x32x64xbf16>
    %225 = vector.shape_cast %224 : vector<1x32x64xbf16> to vector<32x64xbf16>
    %cst_70 = arith.constant dense<0.000000e+00> : vector<8x64xf32>
    %226 = tpu.matmul %222, %225, %cst_70 {dimension_numbers = #tpu.dot_dimension_numbers<[1], [0], [0], [1], [0, 0, 1, 1], [], []>} : vector<8x32xbf16>, vector<32x64xbf16>, vector<8x64xf32> -> vector<8x64xf32>
    %227 = arith.index_cast %c1_i32 : i32 to index
    %c0_71 = arith.constant 0 : index
    %c0_72 = arith.constant 0 : index
    %228 = vector.load %arg11[%227, %c0_71, %c0_72] : memref<2x1x64xf32, #tpu.memory_space<vmem>>, vector<1x1x64xf32>
    %229 = vector.shape_cast %228 : vector<1x1x64xf32> to vector<1x64xf32>
    %230 = vector.broadcast %229 : vector<1x64xf32> to vector<8x64xf32>
    %231 = arith.addf %226, %230 : vector<8x64xf32>
    %cst_73 = arith.constant 0.000000e+00 : f32
    %232 = vector.broadcast %cst_73 : f32 to vector<8x64xf32>
    %233 = arith.maximumf %231, %232 : vector<8x64xf32>
    %234 = arith.truncf %233 : vector<8x64xf32> to vector<8x64xbf16>
    %235 = arith.index_cast %c1_i32 : i32 to index
    %c0_74 = arith.constant 0 : index
    %c0_75 = arith.constant 0 : index
    %236 = vector.load %arg9[%235, %c0_74, %c0_75] : memref<2x64x32xbf16, #tpu.memory_space<vmem>>, vector<1x64x32xbf16>
    %237 = vector.shape_cast %236 : vector<1x64x32xbf16> to vector<64x32xbf16>
    %cst_76 = arith.constant dense<0.000000e+00> : vector<8x32xf32>
    %238 = tpu.matmul %234, %237, %cst_76 {dimension_numbers = #tpu.dot_dimension_numbers<[1], [0], [0], [1], [0, 0, 1, 1], [], []>} : vector<8x64xbf16>, vector<64x32xbf16>, vector<8x32xf32> -> vector<8x32xf32>
    %239 = vector.broadcast %138 : vector<1x32xf32> to vector<8x32xf32>
    %240 = arith.addf %238, %239 : vector<8x32xf32>
    %241 = arith.addf %221, %240 : vector<8x32xf32>
    %cst_77 = arith.constant dense<0.000000e+00> : vector<8xf32>
    %242 = vector.multi_reduction <add>, %241, %cst_77 [1] : vector<8x32xf32> to vector<8xf32>
    %243 = vector.shape_cast %242 : vector<8xf32> to vector<8x1xf32>
    %cst_78 = arith.constant 3.200000e+01 : f32
    %244 = vector.broadcast %cst_78 : f32 to vector<8x1xf32>
    %245 = arith.divf %243, %244 : vector<8x1xf32>
    %246 = vector.broadcast %245 : vector<8x1xf32> to vector<8x32xf32>
    %247 = arith.subf %241, %246 : vector<8x32xf32>
    %248 = arith.mulf %247, %247 : vector<8x32xf32>
    %cst_79 = arith.constant dense<0.000000e+00> : vector<8xf32>
    %249 = vector.multi_reduction <add>, %248, %cst_79 [1] : vector<8x32xf32> to vector<8xf32>
    %250 = vector.shape_cast %249 : vector<8xf32> to vector<8x1xf32>
    %cst_80 = arith.constant 3.200000e+01 : f32
    %251 = vector.broadcast %cst_80 : f32 to vector<8x1xf32>
    %252 = arith.divf %250, %251 : vector<8x1xf32>
    %253 = vector.broadcast %245 : vector<8x1xf32> to vector<8x32xf32>
    %254 = arith.subf %241, %253 : vector<8x32xf32>
    %cst_81 = arith.constant 9.99999974E-6 : f32
    %255 = vector.broadcast %cst_81 : f32 to vector<8x1xf32>
    %256 = arith.addf %252, %255 : vector<8x1xf32>
    %257 = math.rsqrt %256 : vector<8x1xf32>
    %258 = vector.broadcast %257 : vector<8x1xf32> to vector<8x32xf32>
    %259 = arith.mulf %254, %258 : vector<8x32xf32>
    %260 = vector.broadcast %141 : vector<1x32xf32> to vector<8x32xf32>
    %261 = arith.mulf %259, %260 : vector<8x32xf32>
    %262 = vector.broadcast %142 : vector<1x32xf32> to vector<8x32xf32>
    %263 = arith.addf %261, %262 : vector<8x32xf32>
    %c2_i32 = arith.constant 2 : i32
    %c0_82 = arith.constant 0 : index
    %c0_83 = arith.constant 0 : index
    %c0_84 = arith.constant 0 : index
    %264 = vector.load %arg12[%c0_82, %c0_83, %c0_84] : memref<1x8x32xf32, #tpu.memory_space<vmem>>, vector<1x8x32xf32>
    %265 = vector.shape_cast %264 : vector<1x8x32xf32> to vector<8x32xf32>
    %266 = vector.shape_cast %263 : vector<8x32xf32> to vector<1x8x32xf32>
    tpu.vector_store %arg12[%c0_82, %c0_83, %c0_84], %266 {strides = array<i32>} : memref<1x8x32xf32, #tpu.memory_space<vmem>>, vector<1x8x32xf32>,
    return
  }
  func.func @transform_0(%arg0: i32) -> (i32, i32, i32) {
    %c0_i32 = arith.constant 0 : i32
    %c0_i32_0 = arith.constant 0 : i32
    %c0_i32_1 = arith.constant 0 : i32
    return %arg0, %c0_i32, %c0_i32_0 : i32, i32, i32
  }
  func.func @transform_1(%arg0: i32) -> (i32, i32, i32) {
    %c0_i32 = arith.constant 0 : i32
    %c0_i32_0 = arith.constant 0 : i32
    %c0_i32_1 = arith.constant 0 : i32
    return %arg0, %c0_i32, %c0_i32_0 : i32, i32, i32
  }
  func.func @transform_2(%arg0: i32) -> (i32, i32, i32) {
    %c0_i32 = arith.constant 0 : i32
    %c0_i32_0 = arith.constant 0 : i32
    %c0_i32_1 = arith.constant 0 : i32
    %c0_i32_2 = arith.constant 0 : i32
    return %c0_i32, %c0_i32_0, %c0_i32_1 : i32, i32, i32
  }
  func.func @transform_3(%arg0: i32) -> (i32, i32, i32) {
    %c0_i32 = arith.constant 0 : i32
    %c0_i32_0 = arith.constant 0 : i32
    %c0_i32_1 = arith.constant 0 : i32
    %c0_i32_2 = arith.constant 0 : i32
    return %c0_i32, %c0_i32_0, %c0_i32_1 : i32, i32, i32
  }
  func.func @transform_4(%arg0: i32) -> (i32, i32, i32) {
    %c0_i32 = arith.constant 0 : i32
    %c0_i32_0 = arith.constant 0 : i32
    %c0_i32_1 = arith.constant 0 : i32
    %c0_i32_2 = arith.constant 0 : i32
    return %c0_i32, %c0_i32_0, %c0_i32_1 : i32, i32, i32
  }
  func.func @transform_5(%arg0: i32) -> (i32, i32, i32) {
    %c0_i32 = arith.constant 0 : i32
    %c0_i32_0 = arith.constant 0 : i32
    %c0_i32_1 = arith.constant 0 : i32
    %c0_i32_2 = arith.constant 0 : i32
    return %c0_i32, %c0_i32_0, %c0_i32_1 : i32, i32, i32
  }
  func.func @transform_6(%arg0: i32) -> (i32, i32, i32) {
    %c0_i32 = arith.constant 0 : i32
    %c0_i32_0 = arith.constant 0 : i32
    %c0_i32_1 = arith.constant 0 : i32
    %c0_i32_2 = arith.constant 0 : i32
    return %c0_i32, %c0_i32_0, %c0_i32_1 : i32, i32, i32
  }
  func.func @transform_7(%arg0: i32) -> (i32, i32, i32) {
    %c0_i32 = arith.constant 0 : i32
    %c0_i32_0 = arith.constant 0 : i32
    %c0_i32_1 = arith.constant 0 : i32
    %c0_i32_2 = arith.constant 0 : i32
    return %c0_i32, %c0_i32_0, %c0_i32_1 : i32, i32, i32
  }
  func.func @transform_8(%arg0: i32) -> (i32, i32, i32) {
    %c0_i32 = arith.constant 0 : i32
    %c0_i32_0 = arith.constant 0 : i32
    %c0_i32_1 = arith.constant 0 : i32
    %c0_i32_2 = arith.constant 0 : i32
    return %c0_i32, %c0_i32_0, %c0_i32_1 : i32, i32, i32
  }
  func.func @transform_9(%arg0: i32) -> (i32, i32, i32) {
    %c0_i32 = arith.constant 0 : i32
    %c0_i32_0 = arith.constant 0 : i32
    %c0_i32_1 = arith.constant 0 : i32
    %c0_i32_2 = arith.constant 0 : i32
    return %c0_i32, %c0_i32_0, %c0_i32_1 : i32, i32, i32
  }
  func.func @transform_10(%arg0: i32) -> (i32, i32, i32) {
    %c0_i32 = arith.constant 0 : i32
    %c0_i32_0 = arith.constant 0 : i32
    %c0_i32_1 = arith.constant 0 : i32
    %c0_i32_2 = arith.constant 0 : i32
    return %c0_i32, %c0_i32_0, %c0_i32_1 : i32, i32, i32
  }
  func.func @transform_11(%arg0: i32) -> (i32, i32, i32) {
    %c0_i32 = arith.constant 0 : i32
    %c0_i32_0 = arith.constant 0 : i32
    %c0_i32_1 = arith.constant 0 : i32
    return %arg0, %c0_i32, %c0_i32_0 : i32, i32, i32
  }
}

</mosaic_0001>

<bundles_post_ra>
// kernel: transformer_encoder.1
= control target key start
LH: loop header
LB: loop body
LE: loop exit
PB: predicated region body
PF: predicated region fallthrough
CT: control target
= control target key end

     0   :  { %16 = vsyncpa [#allocation3], 0  ;;  %s3527_s0 = inlined_call_operand.vmem [shape: f32[2,8,32], index: 0, kind: input, shape index: {}]   ;;  %s3528_s1 = inlined_call_operand.vmem [shape: f32[2,8,32], index: 1, kind: input, shape index: {}]   ;;  %s3529_s2 = inlined_call_operand.vmem [shape: bf16[2,32,64], index: 2, kind: input, shape index: {}]   ;;  %s3530_s3 = inlined_call_operand.hbm [shape: f32[2,1,64], index: 3, kind: input, shape index: {}]   ;;  %s3531_s4 = inlined_call_operand.vmem [shape: bf16[2,32,32], index: 4, kind: input, shape index: {}]   ;;  %s3532_s5 = inlined_call_operand.vmem [shape: f32[2,1,32], index: 5, kind: input, shape index: {}]   ;;  %s3533_s6 = inlined_call_operand.vmem [shape: bf16[2,32,32], index: 6, kind: input, shape index: {}]   ;;  %s3534_s7 = inlined_call_operand.vmem [shape: bf16[2,32,64], index: 7, kind: input, shape index: {}]   ;;  %s3535_s8 = inlined_call_operand.vmem [shape: bf16[2,64,32], index: 8, kind: input, shape index: {}]   ;;  %s3536_s9 = inlined_call_operand.vmem [shape: f32[2,6,32], index: 9, kind: input, shape index: {}]   ;;  %s3537_s10 = inlined_call_operand.hbm [shape: f32[2,1,64], index: 10, kind: input, shape index: {}]   ;;  %s3538_s11 = inlined_call_operand.vmem [shape: f32[2,8,32], index: 11, kind: output, shape index: {}]  }
   0x1   :  { %17 = vsyncpa [#allocation5], 0  ;;  %s2903_s17 = smov 0  }
   0x2 LB: > { %s309_s20 = sshll.u32 %s3530_s3, 4  ;;  %s2457_s21 = sadd.s32 4294967295, %s2827_s17   ;;  %s2827_s17 = sphi %s2903_s17, %s23_s17   ;;  %s310_s20 = int_to_ptr.hbm [resolvable:$true] %s309_s20 }
   0x3   : > { %p2459_p0 = scmp.ge.s32.totalorder %s2827_s17, 1  ;;  %p295_p1 = scmp.lt.s32.totalorder %s2827_s17, 3 }
   0x4   : > { %p2658_p2 = scmp.eq.s32.totalorder %s2457_s21, 0  ;;  %s2829_s23 = smov [#allocation2]  }
   0x5   : > { %p2914_p3 = pnand %p2459_p0, %p295_p1  ;;  %s311_s24 = sshll.u32 %s2829_s23, 4  ;;  %s312_s24 = int_to_ptr.vmem [resolvable:$true] %s311_s24 }
   0x6   : > { %s341_s27 = sshll.u32 %s3537_s10, 4  ;;  %s2830_s28 = smov [#allocation4]   ;;  %s342_s27 = int_to_ptr.hbm [resolvable:$true] %s341_s27 }
   0x7   : > { %p2651_p4 = pneg %p2914_p3  ;;  %s343_s29 = sshll.u32 %s2830_s28, 4  ;;  %s344_s29 = int_to_ptr.vmem [resolvable:$true] %s343_s29 }
   0x8   : > { %s2831_s30 = smov 16   ;;  %s2832_s12 = smov 1  }
   0x9   : > { %p2652_p5 = pnand %p2658_p2, %p2651_p4  ;;  %373 = sbr.rel (%p2914_p3) target bundleno = 4040 (0xfc8), region = 64 }
   0xb   : > { %2654 = dma.hbm_to_vmem [thread:$0]  (!%p2652_p5), %s310_s20, 32, %s312_s24, [#allocation3], %s2831_s30, %s2831_s30, %s2832_s12  }
   0xc   : > { %2657 = dma.hbm_to_vmem [thread:$0]  (!%p2652_p5), %s342_s27, 32, %s344_s29, [#allocation5], %s2831_s30, %s2831_s30, %s2832_s12  }
   0xe   : > { %2818 = dma.done.wait (%p2658_p2), [#allocation3], 32  }
   0xf   : > { %2820 = vsyncadd (%p2658_p2), [#allocation3], 4294967264 }
  0x10   : > { %2822 = dma.done.wait (%p2658_p2), [#allocation5], 32  }
  0x11   : > { %2824 = vsyncadd (%p2658_p2), [#allocation5], 4294967264  ;;  %p421_p6 = scmp.lt.s32.totalorder %s2457_s21, 1  ;;  %v2620_v0 = vld [vmem:[%s3529_s2 + $0x8] sm:$0xff]  ;;  %v2619_v2 = vld [vmem:[%s3529_s2] sm:$0xff]  ;;  %vm459_vm0 = vcmask 261120  }
  0x12   : > { %469 = vmatpush.bf16.msra.mxu0 %v2620_v0  ;;  %v2704_v6 = vld [vmem:[#allocation2] ss:$0 sm:$0xff]  ;;  %s2833_s25 = smov 104   ;;  %s2834_s26 = smov 120   ;;  %v2622_v15 = vld [vmem:[%s3531_s4 + $0x8] sm:$0xff]  ;;  %vm524_vm1 = vcmask 1047556  }
  0x13   : > { %s3541_s21 = smov (!%p421_p6, %s2457_s21), 1  ;;  %s2835_s27 = smov 112   ;;  %506 = vmatpush.bf16.msra.mxu1 %v2622_v15  ;;  %v2837_v17 = vmov 1983009808   ;;  %v2621_v19 = vld [vmem:[%s3531_s4] sm:$0xff]  ;;  %vm888_vm2 = vcmask 64512  }
  0x14   : > { %s2930_s13 = sshll.u32 %s3541_s21, 3  ;;  %s2836_s28 = smov 96   ;;  %v529_v18 = vunpack.c.l.s4 %v2837_v17  ;;  %v2838_v33 = vmov 1934713408   ;;  %vm1020_vm3 = vcmask 1043456   ;;  %vm1217_vm4 = vcmask 130048  }
  0x15   : > { %s424_s16 = scalar_lea.vmem %s3527_s0, %s2930_s13  ;;  %s2940_s20 = scalar_lea.vmem %s3528_s1, %s2930_s13  ;;  %v553_v34 = vunpack.c.l.s4 %v2838_v33  ;;  %vm1219_vm5 = vcmask 195584   ;;  %vm1361_vm10 = vcmask 523264  }
  0x16   : > { %v2945_v1 = vld [vmem:[%s424_s16] sm:$0xff]  ;;  %470 = vmatpush.bf16.msra.mxu0 %v2619_v2  ;;  %v2968_v24 = vunpack.c.0.s8 %v529_v18  ;;  %s2839_s18 = smov 24   ;;  %s2840_s19 = smov 16  }
  0x17   : > { %v435_v3 = vld [vmem:[%s2940_s20] sm:$0xff]  ;;  %507 = vmatpush.bf16.msra.mxu1 %v2621_v19  ;;  %v476_v23 = vpack.c.bf16 %v2945_v1, %v2945_v1  ;;  %v2979_v39 = vunpack.c.0.s8 %v553_v34  ;;  %s2841_s22 = smov 8   ;;  %s432_s16 = scalar_lea.vmem %s3538_s11, %s2930_s13 }
  0x18   : > { %v437_v4 = vadd.f32 %v435_v3, %v2945_v1 }
  0x1a   : > { %v438_v5 = vpack.c.bf16 %v437_v4, %v437_v4  ;;  %2486 = vmatmul.msk.bf16.vlgmr.msra.gmra.mxu1 %vm459_vm0, %v476_v23 }
  0x1c   : > { %2477 = vmatmul.msk.bf16.vlgmr.msra.gmra.mxu0 %vm459_vm0, %v438_v5 }
  0x99   : > { %v472_v7 = vpop.f32.mrf.mxu0 }
  0x9a   : > { %v473_v8 = vadd.f32 %v2704_v6, %v472_v7 }
  0x9c   : > { %520 = vrot.lane.b32.xlu1 %v473_v8, %s2833_s25  ;;  %514 = vrot.lane.b32.xlu0 %v473_v8, %s2834_s26  ;;  %v526_v20 = vrot.slane %v473_v8, 4 }
  0xa1   : > { %v474_v9 = vpop.f32.mrf.mxu0 }
  0xa4   : > { %517 = vrot.lane.b32.xlu0 %v473_v8, %s2835_s27 }
 0x10e   : > { %v515_v10 = vpop.permute.xlu0 %514  ;;  %v521_v12 = vpop.permute.xlu1 %520 }
 0x10f   : > { %v2684_v11 = vpack.i.bf16 %v515_v10, %v473_v8  ;;  %v536_v25 = vrot.slane %v521_v12, 4  ;;  %v538_v26 = vrot.slane %v515_v10, 4 }
 0x111   : > { %2685 = vrot.lane.b32.xlu1 %v2684_v11, %s2836_s28  ;;  %v537_v29 = vsel %vm524_vm1, %v536_v25, %v515_v10  ;;  %v539_v30 = vsel %vm524_vm1, %v521_v12, %v538_v26 }
 0x112   : > { %v543_v35 = vperm.slane %v537_v29, %v2968_v24  ;;  %v547_v36 = vperm.slane %v539_v30, %v2968_v24 }
 0x114   : > { %v548_v40 = vrot.slane %v543_v35, 4  ;;  %v560_v41 = vrot.slane %v547_v36, 4 }
 0x116   : > { %v518_v13 = vpop.permute.xlu0 %517 }
 0x117   : > { %v2689_v14 = vpack.i.bf16 %v521_v12, %v518_v13  ;;  %v523_v16 = vrot.slane %v518_v13, 4  ;;  %v527_v22 = vsel %vm524_vm1, %v518_v13, %v526_v20 }
 0x118   : > { %v535_v28 = vperm.slane %v527_v22, %v2968_v24 }
 0x119   : > { %2690 = vrot.lane.b32.xlu2 %v2689_v14, %s2836_s28  ;;  %v525_v21 = vsel %vm524_vm1, %v523_v16, %v473_v8 }
 0x11a   : > { %v531_v27 = vperm.slane %v525_v21, %v2968_v24  ;;  %v562_v32 = vrot.slane %v535_v28, 4  ;;  %v561_v46 = vsel %vm524_vm1, %v560_v41, %v535_v28 }
 0x11b   : > { %v567_v50 = vperm.slane %v561_v46, %v2979_v39 }
 0x11c   : > { %v550_v31 = vrot.slane %v531_v27, 4  ;;  %v563_v38 = vsel %vm524_vm1, %v547_v36, %v562_v32  ;;  %v549_v45 = vsel %vm524_vm1, %v548_v40, %v531_v27 }
 0x11d   : > { %v571_v43 = vperm.slane %v563_v38, %v2979_v39  ;;  %v555_v49 = vperm.slane %v549_v45, %v2979_v39  ;;  %v576_v60 = vrot.slane %v567_v50, 4 }
 0x11e   : > { %v551_v37 = vsel %vm524_vm1, %v543_v35, %v550_v31 }
 0x11f   : > { %v559_v42 = vperm.slane %v551_v37, %v2979_v39  ;;  %v578_v52 = vrot.slane %v571_v43, 4  ;;  %v572_v58 = vrot.slane %v555_v49, 4  ;;  %v577_v15 = vsel %vm524_vm1, 0.0, %v576_v60 }
 0x121   : > { %v574_v51 = vrot.slane %v559_v42, 4  ;;  %v579_v61 = vsel %vm524_vm1, 0.0, %v578_v52  ;;  %v591_v3 = vsel %vm524_vm1, %v578_v52, %v567_v50  ;;  %v573_v14 = vsel %vm524_vm1, 0.0, %v572_v58 }
 0x122   : > { %v596_v7 = vrot.slane %v579_v61, 4  ;;  %v595_v21 = vperm.slane %v591_v3, %v2968_v24 }
 0x123   : > { %v575_v59 = vsel %vm524_vm1, 0.0, %v574_v51  ;;  %v580_v16 = vsel %vm524_vm1, %v574_v51, %v555_v49 }
 0x124   : > { %v585_v6 = vrot.slane %v575_v59, 4  ;;  %v584_v26 = vperm.slane %v580_v16, %v2968_v24  ;;  %v597_v27 = vsel %vm524_vm1, %v596_v7, %v577_v15  ;;  %v616_v40 = vrot.slane %v595_v21, 4 }
 0x125   : > { %v601_v35 = vperm.slane %v597_v27, %v2968_v24 }
 0x126   : > { %v586_v25 = vsel %vm524_vm1, %v585_v6, %v573_v14  ;;  %v604_v43 = vrot.slane %v584_v26, 4 }
 0x127   : > { %v590_v34 = vperm.slane %v586_v25, %v2968_v24 }
 0x129   : > { %v602_v51 = vrot.slane %v590_v34, 4  ;;  %v605_v61 = vsel %vm524_vm1, %v590_v34, %v604_v43 }
 0x173   : > { %v2691_v44 = vpop.permute.xlu2 %2690 }
 0x174   : > { %v2693_v47 = vunpack.i.h.bf16 %v2691_v44  ;;  %v2692_v48 = vunpack.i.l.bf16 %v2691_v44 }
 0x176   : > { %v662_v54 = vrot.slane %v2693_v47, 4  ;;  %v650_v55 = vrot.slane %v2692_v48, 4 }
 0x183   : > { %v2686_v53 = vpop.permute.xlu1 %2685 }
 0x184   : > { %v2688_v56 = vunpack.i.h.bf16 %v2686_v53  ;;  %v2687_v57 = vunpack.i.l.bf16 %v2686_v53 }
 0x186   : > { %v664_v62 = vrot.slane %v2688_v56, 4  ;;  %v651_v63 = vsel %vm524_vm1, %v650_v55, %v2687_v57  ;;  %v652_v0 = vrot.slane %v2687_v57, 4  ;;  %v663_v2 = vsel %vm524_vm1, %v662_v54, %v2688_v56 }
 0x187   : > { %v657_v4 = vperm.slane %v651_v63, %v2968_v24  ;;  %v669_v5 = vperm.slane %v663_v2, %v2968_v24  ;;  %v614_v55 = vrot.slane %v601_v35, 4  ;;  %v617_v63 = vsel %vm524_vm1, %v601_v35, %v616_v40 }
 0x188   : > { %v653_v8 = vsel %vm524_vm1, %v2692_v48, %v652_v0  ;;  %v665_v9 = vsel %vm524_vm1, %v2693_v47, %v664_v62  ;;  %v603_v0 = vsel %vm524_vm1, %v602_v51, %v584_v26 }
 0x189   : > { %v661_v10 = vperm.slane %v653_v8, %v2968_v24  ;;  %v673_v11 = vperm.slane %v665_v9, %v2968_v24  ;;  %v674_v12 = vrot.slane %v669_v5, 4  ;;  %v676_v13 = vrot.slane %v657_v4, 4 }
 0x18a   : > { %v613_v9 = vperm.slane %v605_v61, %v2979_v39 }
 0x18b   : > { %v675_v17 = vsel %vm524_vm1, %v674_v12, %v657_v4  ;;  %v677_v18 = vsel %vm524_vm1, %v669_v5, %v676_v13  ;;  %v686_v19 = vrot.slane %v673_v11, 4  ;;  %v688_v20 = vrot.slane %v661_v10, 4 }
 0x18c   : > { %v681_v22 = vperm.slane %v675_v17, %v2979_v39  ;;  %v685_v23 = vperm.slane %v677_v18, %v2979_v39  ;;  %v615_v5 = vsel %vm524_vm1, %v614_v55, %v595_v21  ;;  %v609_v12 = vperm.slane %v603_v0, %v2979_v39 }
 0x18d   : > { %v687_v28 = vsel %vm524_vm1, %v686_v19, %v661_v10  ;;  %v689_v29 = vsel %vm524_vm1, %v673_v11, %v688_v20  ;;  %v625_v11 = vperm.slane %v617_v63, %v2979_v39  ;;  %v621_v18 = vperm.slane %v615_v5, %v2979_v39 }
 0x18e   : > { %v693_v30 = vperm.slane %v687_v28, %v2979_v39  ;;  %v697_v31 = vperm.slane %v689_v29, %v2979_v39  ;;  %v698_v32 = vrot.slane %v681_v22, 4  ;;  %v700_v33 = vrot.slane %v685_v23, 4 }
 0x18f   : > { %v628_v28 = vrot.slane %v609_v12, 4  ;;  %v630_v29 = vrot.slane %v625_v11, 4  ;;  %v626_v34 = vrot.slane %v621_v18, 4 }
 0x190   : > { %v701_v36 = vsel %vm524_vm1, 0.0, %v700_v33  ;;  %v702_v37 = vrot.slane %v693_v30, 4  ;;  %v704_v38 = vrot.slane %v697_v31, 4  ;;  %v706_v41 = vsel %vm524_vm1, %v700_v33, %v681_v22 }
 0x191   : > { %v711_v42 = vrot.slane %v701_v36, 4  ;;  %v699_v44 = vsel %vm524_vm1, 0.0, %v698_v32  ;;  %v710_v46 = vperm.slane %v706_v41, %v2968_v24  ;;  %v632_v22 = vrot.slane %v613_v9, 4 }
 0x192   : > { %v705_v45 = vsel %vm524_vm1, 0.0, %v704_v38  ;;  %v717_v47 = vsel %vm524_vm1, %v704_v38, %v693_v30  ;;  %v703_v52 = vsel %vm524_vm1, 0.0, %v702_v37  ;;  %v629_v36 = vsel %vm524_vm1, %v621_v18, %v628_v28 }
 0x193   : > { %v722_v48 = vrot.slane %v705_v45, 4  ;;  %v712_v49 = vsel %vm524_vm1, %v711_v42, %v699_v44  ;;  %v721_v50 = vperm.slane %v717_v47, %v2968_v24  ;;  %v730_v54 = vrot.slane %v710_v46, 4  ;;  %v509_v44 = vpop.f32.mrf.mxu1 }
 0x194   : > { %v716_v53 = vperm.slane %v712_v49, %v2968_v24  ;;  %v633_v33 = vsel %vm524_vm1, %v625_v11, %v632_v22  ;;  %v631_v37 = vsel %vm524_vm1, %v630_v29, %v613_v9  ;;  %v627_v40 = vsel %vm524_vm1, %v626_v34, %v609_v12 }
 0x195   : > { %v723_v56 = vsel %vm524_vm1, %v722_v48, %v703_v52  ;;  %v742_v57 = vrot.slane %v721_v50, 4  ;;  %v637_v38 = vpack.c.bf16 %v633_v33, %v633_v33  ;;  %v635_v41 = vpack.c.bf16 %v629_v36, %v629_v36 }
 0x196   : > { %v727_v58 = vperm.slane %v723_v56, %v2968_v24  ;;  %v731_v59 = vsel %vm524_vm1, %v716_v53, %v730_v54  ;;  %v728_v60 = vrot.slane %v716_v53, 4  ;;  %v636_v42 = vpack.c.bf16 %v631_v37, %v631_v37 }
 0x197   : > { %v739_v62 = vperm.slane %v731_v59, %v2979_v39  ;;  %v634_v43 = vpack.c.bf16 %v627_v40, %v627_v40 }
 0x198   : > { %v743_v2 = vsel %vm524_vm1, %v727_v58, %v742_v57  ;;  %v729_v3 = vsel %vm524_vm1, %v728_v60, %v710_v46  ;;  %v740_v4 = vrot.slane %v727_v58, 4 }
 0x199   : > { %v751_v6 = vperm.slane %v743_v2, %v2979_v39  ;;  %v758_v7 = vrot.slane %v739_v62, 4  ;;  %v735_v8 = vperm.slane %v729_v3, %v2979_v39 }
 0x19a   : > { %v741_v10 = vsel %vm524_vm1, %v740_v4, %v721_v50 }
 0x19b   : > { %v759_v13 = vsel %vm524_vm1, %v751_v6, %v758_v7  ;;  %v747_v14 = vperm.slane %v741_v10, %v2979_v39  ;;  %v754_v15 = vrot.slane %v735_v8, 4  ;;  %v756_v16 = vrot.slane %v751_v6, 4  ;;  %v511_v45 = vpop.f32.mrf.mxu1 }
 0x19c   : > { %v763_v17 = vpack.c.bf16 %v759_v13, %v759_v13 }
 0x19d   : > { %v755_v19 = vsel %vm524_vm1, %v747_v14, %v754_v15  ;;  %v757_v20 = vsel %vm524_vm1, %v756_v16, %v739_v62  ;;  %v752_v21 = vrot.slane %v747_v14, 4  ;;  %v2705_v62 = vld [vmem:[%s3532_s5] ss:$0 sm:$0xff] }
 0x19e   : > { %v950_v23 = vsel %vm888_vm2, %v763_v17, 0  ;;  %v761_v25 = vpack.c.bf16 %v755_v19, %v755_v19  ;;  %v762_v26 = vpack.c.bf16 %v757_v20, %v757_v20  ;;  %v510_v63 = vadd.f32 %v2705_v62, %v509_v44 }
 0x19f   : > { %959 = vmatpush.bf16.xpose.msrb.mxu1 %v950_v23  ;;  %v753_v27 = vsel %vm524_vm1, %v752_v21, %v735_v8 }
 0x1a0   : > { %v912_v30 = vsel %vm888_vm2, %v761_v25, 0  ;;  %v931_v31 = vsel %vm888_vm2, %v762_v26, 0  ;;  %v760_v32 = vpack.c.bf16 %v753_v27, %v753_v27  ;;  %v776_v22 = vrot.slane %v510_v63, 4 }
 0x1a1   : > { %921 = vmatpush.bf16.xpose.msra.mxu3 %v912_v30  ;;  %940 = vmatpush.bf16.xpose.msrb.mxu0 %v931_v31 }
 0x1a2   : > { %v893_v35 = vsel %vm888_vm2, %v760_v32, 0 }
 0x1a3   : > { %902 = vmatpush.bf16.xpose.msra.mxu2 %v893_v35 }
 0x1a6   : > { %2490 = vmatmul.msk.bf16.vlgmr.msrb.gmra.mxu1 %vm888_vm2, %v637_v38 }
 0x1a8   : > { %2488 = vmatmul.msk.bf16.vlgmr.msra.gmra.mxu3 %vm888_vm2, %v635_v41  ;;  %2489 = vmatmul.msk.bf16.vlgmr.msrb.gmra.mxu0 %vm888_vm2, %v636_v42 }
 0x1aa   : > { %2487 = vmatmul.msk.bf16.vlgmr.msra.gmra.mxu2 %vm888_vm2, %v634_v43 }
 0x223   : > { %v961_v46 = vpop.f32.mrf.mxu1 }
 0x224   : > { %v968_v47 = vmul.f32 0.35355338, %v961_v46 }
 0x225   : > { %v942_v48 = vpop.f32.mrf.mxu0 }
 0x226   : > { %v967_v49 = vmul.f32 0.35355338, %v942_v48  ;;  %v978_v50 = vsel %vm888_vm2, %v968_v47, -inf }
 0x227   : > { %979 = vmax.xlane.f32.xlu2 %v978_v50 }
 0x228   : > { %v975_v51 = vsel %vm888_vm2, %v967_v49, -inf }
 0x229   : > { %976 = vmax.xlane.f32.xlu1 %v975_v51 }
 0x22b   : > { %v923_v52 = vpop.f32.mrf.mxu3  ;;  %v963_v53 = vpop.f32.mrf.mxu1 }
 0x22c   : > { %v966_v54 = vmul.f32 0.35355338, %v923_v52 }
 0x22d   : > { %v904_v55 = vpop.f32.mrf.mxu2  ;;  %v944_v56 = vpop.f32.mrf.mxu0 }
 0x22e   : > { %v965_v57 = vmul.f32 0.35355338, %v904_v55  ;;  %v972_v58 = vsel %vm888_vm2, %v966_v54, -inf }
 0x22f   : > { %973 = vmax.xlane.f32.xlu0 %v972_v58 }
 0x230   : > { %v969_v59 = vsel %vm888_vm2, %v965_v57, -inf }
 0x231   : > { %970 = vmax.xlane.f32.xlu2 %v969_v59 }
 0x233   : > { %v925_v60 = vpop.f32.mrf.mxu3 }
 0x235   : > { %v906_v61 = vpop.f32.mrf.mxu2 }
 0x242   : > { %771 = vrot.lane.b32.xlu1 %v510_v63, %s2833_s25 }
 0x243   : > { %768 = vrot.lane.b32.xlu0 %v510_v63, %s2835_s27 }
 0x249   : > { %765 = vrot.lane.b32.xlu2 %v510_v63, %s2834_s26 }
 0x29a   : > { %v980_v0 = vpop.xlane.xlu2 %979 }
 0x29b   : > { %v984_v11 = vsub.f32 %v968_v47, %v980_v0 }
 0x29c   : > { %v977_v2 = vpop.xlane.xlu1 %976 }
 0x29d   : > { %v983_v3 = vsub.f32 %v967_v49, %v977_v2  ;;  %v991_v14 = vmul.f32 1.442695, %v984_v11 }
 0x29f   : > { %v989_v4 = vmul.f32 1.442695, %v983_v3 }
 0x2a1   : > { %2710 = vpow2.f32 %v989_v4 }
 0x2a2   : > { %v974_v5 = vpop.xlane.xlu0 %973 }
 0x2a3   : > { %v982_v6 = vsub.f32 %v966_v54, %v974_v5 }
 0x2a4   : > { %v971_v7 = vpop.xlane.xlu2 %970 }
 0x2a5   : > { %v987_v8 = vmul.f32 1.442695, %v982_v6  ;;  %v981_v9 = vsub.f32 %v965_v57, %v971_v7 }
 0x2a7   : > { %v3069_v10 = vpop.eup %2710  ;;  %2712 = vpow2.f32 %v987_v8  ;;  %v985_v12 = vmul.f32 1.442695, %v981_v9 }
 0x2a8   : > { %v999_v13 = vsel %vm888_vm2, %v3069_v10, 0.0 }
 0x2a9   : > { %2714 = vpow2.f32 %v985_v12  ;;  %1000 = vadd.xlane.f32.xlu1 %v999_v13 }
 0x2aa   : > { %2716 = vpow2.f32 %v991_v14 }
 0x2ac   : > { %v766_v18 = vpop.permute.xlu2 %765 }
 0x2ad   : > { %v3073_v15 = vpop.eup %2712  ;;  %v788_v20 = vrot.slane %v766_v18, 4 }
 0x2ae   : > { %v996_v16 = vsel %vm888_vm2, %v3073_v15, 0.0 }
 0x2af   : > { %v3077_v17 = vpop.eup %2714  ;;  %997 = vadd.xlane.f32.xlu2 %v996_v16 }
 0x2b0   : > { %v993_v19 = vsel %vm888_vm2, %v3077_v17, 0.0  ;;  %v3081_v23 = vpop.eup %2716 }
 0x2b1   : > { %994 = vadd.xlane.f32.xlu0 %v993_v19  ;;  %v1002_v36 = vsel %vm888_vm2, %v3081_v23, 0.0 }
 0x2b4   : > { %v772_v21 = vpop.permute.xlu1 %771 }
 0x2b5   : > { %v786_v25 = vrot.slane %v772_v21, 4  ;;  %v789_v26 = vsel %vm524_vm1, %v772_v21, %v788_v20  ;;  %v769_v27 = vpop.permute.xlu0 %768 }
 0x2b6   : > { %v797_v28 = vperm.slane %v789_v26, %v2968_v24  ;;  %v774_v29 = vrot.slane %v769_v27, 4  ;;  %v777_v30 = vsel %vm524_vm1, %v769_v27, %v776_v22 }
 0x2b7   : > { %v787_v31 = vsel %vm524_vm1, %v786_v25, %v766_v18  ;;  %v785_v32 = vperm.slane %v777_v30, %v2968_v24 }
 0x2b8   : > { %v793_v33 = vperm.slane %v787_v31, %v2968_v24  ;;  %v810_v34 = vrot.slane %v797_v28, 4  ;;  %v775_v35 = vsel %vm524_vm1, %v774_v29, %v510_v63 }
 0x2b9   : > { %v781_v37 = vperm.slane %v775_v35, %v2968_v24  ;;  %v812_v38 = vrot.slane %v785_v32, 4  ;;  %1003 = vadd.xlane.f32.xlu0 %v1002_v36 }
 0x2ba   : > { %v798_v40 = vrot.slane %v793_v33, 4  ;;  %v811_v41 = vsel %vm524_vm1, %v810_v34, %v785_v32 }
 0x2bb   : > { %v800_v42 = vrot.slane %v781_v37, 4  ;;  %v813_v43 = vsel %vm524_vm1, %v797_v28, %v812_v38  ;;  %v817_v44 = vperm.slane %v811_v41, %v2979_v39 }
 0x2bc   : > { %v799_v45 = vsel %vm524_vm1, %v798_v40, %v781_v37  ;;  %v821_v46 = vperm.slane %v813_v43, %v2979_v39 }
 0x2bd   : > { %v801_v47 = vsel %vm524_vm1, %v793_v33, %v800_v42  ;;  %v805_v48 = vperm.slane %v799_v45, %v2979_v39  ;;  %v826_v50 = vrot.slane %v817_v44, 4 }
 0x2be   : > { %v809_v49 = vperm.slane %v801_v47, %v2979_v39  ;;  %v828_v51 = vrot.slane %v821_v46, 4 }
 0x2bf   : > { %v822_v52 = vrot.slane %v805_v48, 4  ;;  %v827_v59 = vsel %vm524_vm1, 0.0, %v826_v50 }
 0x2c0   : > { %v824_v53 = vrot.slane %v809_v49, 4  ;;  %v829_v54 = vsel %vm524_vm1, 0.0, %v828_v51  ;;  %v841_v55 = vsel %vm524_vm1, %v828_v51, %v817_v44 }
 0x2c1   : > { %v845_v56 = vperm.slane %v841_v55, %v2968_v24  ;;  %v846_v57 = vrot.slane %v829_v54, 4  ;;  %v823_v2 = vsel %vm524_vm1, 0.0, %v822_v52 }
 0x2c2   : > { %v825_v58 = vsel %vm524_vm1, 0.0, %v824_v53  ;;  %v830_v60 = vsel %vm524_vm1, %v824_v53, %v805_v48 }
 0x2c3   : > { %v835_v61 = vrot.slane %v825_v58, 4  ;;  %v847_v62 = vsel %vm524_vm1, %v846_v57, %v827_v59  ;;  %v866_v63 = vrot.slane %v845_v56, 4  ;;  %v834_v0 = vperm.slane %v830_v60, %v2968_v24 }
 0x2c4   : > { %v851_v3 = vperm.slane %v847_v62, %v2968_v24 }
 0x2c5   : > { %v836_v4 = vsel %vm524_vm1, %v835_v61, %v823_v2  ;;  %v854_v5 = vrot.slane %v834_v0, 4 }
 0x2c6   : > { %v840_v6 = vperm.slane %v836_v4, %v2968_v24  ;;  %v867_v7 = vsel %vm524_vm1, %v851_v3, %v866_v63  ;;  %v864_v8 = vrot.slane %v851_v3, 4 }
 0x2c7   : > { %v875_v9 = vperm.slane %v867_v7, %v2979_v39 }
 0x2c8   : > { %v855_v11 = vsel %vm524_vm1, %v840_v6, %v854_v5  ;;  %v852_v12 = vrot.slane %v840_v6, 4  ;;  %v865_v13 = vsel %vm524_vm1, %v864_v8, %v845_v56 }
 0x2c9   : > { %v863_v14 = vperm.slane %v855_v11, %v2979_v39  ;;  %v880_v16 = vrot.slane %v875_v9, 4  ;;  %v871_v18 = vperm.slane %v865_v13, %v2979_v39 }
 0x2ca   : > { %v853_v19 = vsel %vm524_vm1, %v852_v12, %v834_v0 }
 0x2cb   : > { %v881_v20 = vsel %vm524_vm1, %v880_v16, %v863_v14  ;;  %v859_v21 = vperm.slane %v853_v19, %v2979_v39  ;;  %v876_v22 = vrot.slane %v871_v18, 4  ;;  %v882_v25 = vrot.slane %v863_v14, 4 }
 0x2cc   : > { %v886_v26 = vpack.c.bf16 %v881_v20, %v881_v20 }
 0x2cd   : > { %v877_v27 = vsel %vm524_vm1, %v876_v22, %v859_v21  ;;  %v883_v28 = vsel %vm524_vm1, %v875_v9, %v882_v25  ;;  %v878_v29 = vrot.slane %v859_v21, 4 }
 0x2ce   : > { %v1060_v30 = vsel %vm1020_vm3, %v886_v26, 0  ;;  %v884_v31 = vpack.c.bf16 %v877_v27, %v877_v27  ;;  %v887_v32 = vpack.c.bf16 %v883_v28, %v883_v28 }
 0x2cf   : > { %1069 = vmatpush.bf16.msra.mxu0 %v1060_v30  ;;  %v879_v33 = vsel %vm524_vm1, %v871_v18, %v878_v29 }
 0x2d0   : > { %v1022_v34 = vsel %vm1020_vm3, %v884_v31, 0  ;;  %v1079_v35 = vsel %vm1020_vm3, %v887_v32, 0  ;;  %v885_v36 = vpack.c.bf16 %v879_v33, %v879_v33 }
 0x2d1   : > { %1031 = vmatpush.bf16.msrb.mxu2 %v1022_v34  ;;  %1088 = vmatpush.bf16.msra.mxu1 %v1079_v35 }
 0x2d2   : > { %v1041_v37 = vsel %vm1020_vm3, %v885_v36, 0 }
 0x2d3   : > { %1050 = vmatpush.bf16.msrb.mxu3 %v1041_v37 }
 0x31c   : > { %v1001_v38 = vpop.xlane.xlu1 %1000 }
 0x31d   : > { %2718 = vrcp.f32 %v1001_v38 }
 0x322   : > { %v998_v40 = vpop.xlane.xlu2 %997 }
 0x323   : > { %v2719_v41 = vpop.eup %2718  ;;  %2720 = vrcp.f32 %v998_v40 }
 0x324   : > { %v1011_v42 = vmul.f32 %v2719_v41, %v3069_v10  ;;  %v995_v43 = vpop.xlane.xlu0 %994 }
 0x325   : > { %2722 = vrcp.f32 %v995_v43 }
 0x326   : > { %v1015_v44 = vpack.c.bf16 %v1011_v42, %v1011_v42 }
 0x328   : > { %2493 = vmatmul.msk.bf16.vlgmr.msra.gmra.mxu0 %vm888_vm2, %v1015_v44 }
 0x329   : > { %v2721_v45 = vpop.eup %2720 }
 0x32a   : > { %v1010_v46 = vmul.f32 %v2721_v45, %v3073_v15 }
 0x32b   : > { %v2723_v47 = vpop.eup %2722 }
 0x32c   : > { %v1009_v48 = vmul.f32 %v2723_v47, %v3077_v17  ;;  %v1004_v49 = vpop.xlane.xlu0 %1003  ;;  %v1014_v50 = vpack.c.bf16 %v1010_v46, %v1010_v46 }
 0x32d   : > { %2724 = vrcp.f32 %v1004_v49 }
 0x32e   : > { %2492 = vmatmul.msk.bf16.vlgmr.msrb.gmra.mxu3 %vm888_vm2, %v1014_v50  ;;  %v1013_v51 = vpack.c.bf16 %v1009_v48, %v1009_v48 }
 0x330   : > { %2491 = vmatmul.msk.bf16.vlgmr.msrb.gmra.mxu2 %vm888_vm2, %v1013_v51 }
 0x333   : > { %v2725_v10 = vpop.eup %2724 }
 0x334   : > { %v1012_v52 = vmul.f32 %v2725_v10, %v3081_v23 }
 0x336   : > { %v1016_v53 = vpack.c.bf16 %v1012_v52, %v1012_v52 }
 0x338   : > { %2494 = vmatmul.msk.bf16.vlgmr.msra.gmra.mxu1 %vm888_vm2, %v1016_v53 }
 0x3a5   : > { %v1071_v54 = vpop.f32.mrf.mxu0 }
 0x3a6   : > { %v1094_v56 = vrot.slane %v1071_v54, 4 }
 0x3ad   : > { %v1073_v55 = vpop.f32.mrf.mxu0 }
 0x3b1   : > { %v1052_v15 = vpop.f32.mrf.mxu3 }
 0x3b2   : > { %v1108_v17 = vrot.slane %v1052_v15, 4 }
 0x3b3   : > { %v1033_v57 = vpop.f32.mrf.mxu2 }
 0x3b4   : > { %v1095_v58 = vsel %vm524_vm1, %v1094_v56, %v1033_v57  ;;  %v1096_v59 = vrot.slane %v1033_v57, 4 }
 0x3b5   : > { %v1101_v60 = vperm.slane %v1095_v58, %v2968_v24  ;;  %v1090_v61 = vpop.f32.mrf.mxu1 }
 0x3b6   : > { %v1097_v62 = vsel %vm524_vm1, %v1071_v54, %v1096_v59  ;;  %v1106_v63 = vrot.slane %v1090_v61, 4  ;;  %v1109_v23 = vsel %vm524_vm1, %v1090_v61, %v1108_v17  ;;  %v2624_v61 = vld [vmem:[%s3533_s6 + $0x8] sm:$0xff] }
 0x3b7   : > { %v1105_v0 = vperm.slane %v1097_v62, %v2968_v24  ;;  %v1117_v2 = vperm.slane %v1109_v23, %v2968_v24  ;;  %v1120_v4 = vrot.slane %v1101_v60, 4  ;;  %1248 = vmatpush.bf16.msra.mxu2 %v2624_v61  ;;  %v2623_v62 = vld [vmem:[%s3533_s6] sm:$0xff] }
 0x3b8   : > { %v1107_v3 = vsel %vm524_vm1, %v1106_v63, %v1052_v15 }
 0x3b9   : > { %v1132_v5 = vrot.slane %v1105_v0, 4  ;;  %v1113_v6 = vperm.slane %v1107_v3, %v2968_v24  ;;  %v1130_v7 = vrot.slane %v1117_v2, 4  ;;  %v1054_v8 = vpop.f32.mrf.mxu3 }
 0x3bb   : > { %v1118_v9 = vrot.slane %v1113_v6, 4  ;;  %v1121_v11 = vsel %vm524_vm1, %v1113_v6, %v1120_v4  ;;  %v1131_v12 = vsel %vm524_vm1, %v1130_v7, %v1105_v0  ;;  %v1133_v13 = vsel %vm524_vm1, %v1117_v2, %v1132_v5  ;;  %v1035_v14 = vpop.f32.mrf.mxu2  ;;  %1249 = vmatpush.bf16.msra.mxu2 %v2623_v62  ;;  %v3193_v6 = vld [vmem:[%s3536_s9] sm:$0x3f] }
 0x3bc   : > { %v1129_v16 = vperm.slane %v1121_v11, %v2979_v39  ;;  %v1137_v18 = vperm.slane %v1131_v12, %v2979_v39  ;;  %v1141_v19 = vperm.slane %v1133_v13, %v2979_v39  ;;  %v1226_v7 = vperm.slane %v3193_v6, 0 }
 0x3bd   : > { %v1119_v20 = vsel %vm524_vm1, %v1118_v9, %v1101_v60  ;;  %v1092_v21 = vpop.f32.mrf.mxu1  ;;  %v2842_v14 = vmov 32.0  }
 0x3be   : > { %v1125_v22 = vperm.slane %v1119_v20, %v2979_v39  ;;  %v1144_v25 = vrot.slane %v1129_v16, 4  ;;  %v1146_v26 = vrot.slane %v1137_v18, 4  ;;  %v1148_v27 = vrot.slane %v1141_v19, 4 }
 0x3bf   : > { %2726 = vrcp.f32 %v2842_v14 }
 0x3c0   : > { %v1142_v28 = vrot.slane %v1125_v22, 4  ;;  %v1145_v29 = vsel %vm524_vm1, 0.0, %v1144_v25  ;;  %v1149_v30 = vsel %vm524_vm1, 0.0, %v1148_v27  ;;  %v1161_v32 = vsel %vm524_vm1, %v1148_v27, %v1137_v18 }
 0x3c1   : > { %v1155_v31 = vrot.slane %v1145_v29, 4  ;;  %v1166_v33 = vrot.slane %v1149_v30, 4  ;;  %v1150_v34 = vsel %vm524_vm1, %v1144_v25, %v1125_v22  ;;  %v1147_v35 = vsel %vm524_vm1, 0.0, %v1146_v26  ;;  %v2626_v29 = vld [vmem:[%s3534_s7 + $0x8] sm:$0xff]  ;;  %v2625_v30 = vld [vmem:[%s3534_s7] sm:$0xff] }
 0x3c2   : > { %v1143_v36 = vsel %vm524_vm1, 0.0, %v1142_v28  ;;  %v1154_v37 = vperm.slane %v1150_v34, %v2968_v24  ;;  %v1165_v38 = vperm.slane %v1161_v32, %v2968_v24  ;;  %1319 = vmatpush.bf16.msra.mxu3 %v2626_v29  ;;  %v2629_v34 = vld [vmem:[%s3535_s8 + $0x10] sm:$0xff] }
 0x3c3   : > { %v1156_v40 = vsel %vm524_vm1, %v1155_v31, %v1143_v36  ;;  %v1167_v41 = vsel %vm524_vm1, %v1166_v33, %v1147_v35  ;;  %v2630_v31 = vld [vmem:[%s3535_s8 + $0x18] sm:$0xff] }
 0x3c4   : > { %v1160_v42 = vperm.slane %v1156_v40, %v2968_v24  ;;  %v1171_v43 = vperm.slane %v1167_v41, %v2968_v24  ;;  %v1174_v44 = vrot.slane %v1154_v37, 4  ;;  %v1186_v45 = vrot.slane %v1165_v38, 4  ;;  %1369 = vmatpush.bf16.msrb.mxu0 %v2630_v31  ;;  %v2707_v31 = vld [vmem:[#allocation2 + $0x1] ss:$0 sm:$0xff] }
 0x3c5   : > { %v2727_v16 = vpop.eup %2726 }
 0x3c6   : > { %v1175_v46 = vsel %vm524_vm1, %v1160_v42, %v1174_v44  ;;  %v1187_v47 = vsel %vm524_vm1, %v1171_v43, %v1186_v45  ;;  %v1172_v48 = vrot.slane %v1160_v42, 4  ;;  %v1184_v49 = vrot.slane %v1171_v43, 4  ;;  %1320 = vmatpush.bf16.msra.mxu3 %v2625_v30 }
 0x3c7   : > { %v1183_v50 = vperm.slane %v1175_v46, %v2979_v39  ;;  %v1195_v51 = vperm.slane %v1187_v47, %v2979_v39  ;;  %v1260_v18 = vmul.f32 32.0, %v2727_v16  ;;  %vm1264_vm6 = vweird.f32 %v2727_v16 }
 0x3c8   : > { %v1173_v10 = vsel %vm524_vm1, %v1172_v48, %v1154_v37  ;;  %v1185_v52 = vsel %vm524_vm1, %v1184_v49, %v1165_v38  ;;  %1370 = vmatpush.bf16.msrb.mxu0 %v2629_v34  ;;  %v1285_v43 = vperm.slane %v3193_v6, 2  ;;  %v1287_v45 = vperm.slane %v3193_v6, 3 }
 0x3c9   : > { %v1202_v53 = vrot.slane %v1183_v50, 4  ;;  %v1200_v54 = vrot.slane %v1195_v51, 4  ;;  %v1179_v55 = vperm.slane %v1173_v10, %v2979_v39  ;;  %v1191_v15 = vperm.slane %v1185_v52, %v2979_v39  ;;  %v2706_v10 = vld [vmem:[#allocation4] ss:$0 sm:$0xff] }
 0x3ca   : > { %v1261_v19 = vsub.f32 1.0, %v1260_v18 }
 0x3cb   : > { %v1203_v56 = vsel %vm524_vm1, %v1195_v51, %v1202_v53  ;;  %v1201_v57 = vsel %vm524_vm1, %v1200_v54, %v1183_v50  ;;  %v1196_v17 = vrot.slane %v1191_v15, 4  ;;  %v1198_v58 = vrot.slane %v1179_v55, 4  ;;  %v2628_v50 = vld [vmem:[%s3535_s8 + $0x8] sm:$0xff]  ;;  %v2627_v51 = vld [vmem:[%s3535_s8] sm:$0xff] }
 0x3cc   : > { %1213 = vrot.lane.b32.xlu0 %v1203_v56, %s2839_s18  ;;  %1209 = vrot.lane.b32.xlu1 %v1201_v57, %s2840_s19  ;;  %v1262_v20 = vmul.f32 %v2727_v16, %v1261_v19  ;;  %v1336_v56 = vperm.slane %v3193_v6, 1  ;;  %v1401_v19 = vperm.slane %v3193_v6, 4 }
 0x3cd   : > { %v1199_v59 = vsel %vm524_vm1, %v1191_v15, %v1198_v58  ;;  %v1197_v60 = vsel %vm524_vm1, %v1196_v17, %v1179_v55  ;;  %1371 = vmatpush.bf16.msrb.mxu0 %v2628_v50 }
 0x3ce   : > { %1205 = vrot.lane.b32.xlu2 %v1199_v59, %s2841_s22  ;;  %v1263_v21 = vadd.f32 %v2727_v16, %v1262_v20 }
 0x3d0   : > { %v3198_v22 = vsel %vm1264_vm6, %v2727_v16, %v1263_v21  ;;  %v1403_v21 = vperm.slane %v3193_v6, 5 }
 0x3d1   : > { %1372 = vmatpush.bf16.msrb.mxu0 %v2627_v51 }
 0x428   : > { %v1206_v63 = vpop.permute.xlu2 %1205 }
 0x429   : > { %v1216_v23 = vsel %vm888_vm2, %v1197_v60, %v1206_v63 }
 0x43e   : > { %v1214_v0 = vpop.permute.xlu0 %1213  ;;  %v1210_v2 = vpop.permute.xlu1 %1209 }
 0x43f   : > { %v1218_v3 = vsel %vm1217_vm4, %v1216_v23, %v1210_v2  ;;  %v2634_v2 = vld [vmem:[%s3531_s4 + $0x18] sm:$0xff] }
 0x440   : > { %v1220_v4 = vsel %vm1219_vm5, %v1218_v3, %v1214_v0  ;;  %1479 = vmatpush.bf16.msrb.mxu2 %v2634_v2  ;;  %v2632_v3 = vld [vmem:[%s3529_s2 + $0x18] sm:$0xff] }
 0x441   : > { %v1221_v5 = vpack.c.bf16 %v1220_v4, %v1220_v4  ;;  %1440 = vmatpush.bf16.msrb.mxu1 %v2632_v3  ;;  %v2633_v4 = vld [vmem:[%s3531_s4 + $0x10] sm:$0xff] }
 0x443   : > { %2503 = vmatmul.msk.bf16.vlgmr.msra.gmra.mxu2 %vm459_vm0, %v1221_v5  ;;  %v2631_v5 = vld [vmem:[%s3529_s2 + $0x10] sm:$0xff] }
 0x444   : > { %1480 = vmatpush.bf16.msrb.mxu2 %v2633_v4 }
 0x445   : > { %1441 = vmatpush.bf16.msrb.mxu1 %v2631_v5 }
 0x4c6   : > { %v1251_v8 = vpop.f32.mrf.mxu2 }
 0x4c7   : > { %v1252_v9 = vadd.f32 %v1251_v8, %v1226_v7 }
 0x4c9   : > { %v1255_v11 = vadd.f32 %v1252_v9, %v2945_v1 }
 0x4cb   : > { %v1256_v12 = vsel %vm459_vm0, %v1255_v11, 0.0 }
 0x4cc   : > { %1257 = vadd.xlane.f32.xlu2 %v1256_v12 }
 0x4ce   : > { %v1253_v13 = vpop.f32.mrf.mxu2 }
 0x53f   : > { %v1258_v25 = vpop.xlane.xlu2 %1257 }
 0x540   : > { %v1266_v26 = vmul.f32 %v3198_v22, %v1258_v25 }
 0x542   : > { %v1267_v27 = vsub.f32 %v1255_v11, %v1266_v26 }
 0x544   : > { %v1268_v28 = vmul.f32 %v1267_v27, %v1267_v27 }
 0x546   : > { %v1269_v1 = vsel %vm459_vm0, %v1268_v28, 0.0 }
 0x547   : > { %1270 = vadd.xlane.f32.xlu0 %v1269_v1  ;;  %v2752_v1 = vld [vmem:[%s2940_s20] sm:$0xff] }
 0x5ba   : > { %v1271_v32 = vpop.xlane.xlu0 %1270 }
 0x5bb   : > { %v1272_v33 = vmul.f32 %v1271_v32, %v3198_v22 }
 0x5bd   : > { %v1273_v35 = vadd.f32 1e-05, %v1272_v33 }
 0x5bf   : > { %2728 = vrsqrt.f32 %v1273_v35  ;;  %vm1280_vm8 = vweird.f32 %v1273_v35 }
 0x5c5   : > { %v2729_v36 = vpop.eup %2728 }
 0x5c6   : > { %v1275_v37 = vmul.f32 %v2729_v36, %v1273_v35  ;;  %vm1281_vm7 = vweird.f32 %v2729_v36 }
 0x5c7   : > { %vm1282_vm9 = vmor %vm1280_vm8, %vm1281_vm7 }
 0x5c8   : > { %v1276_v38 = vmul.f32 %v2729_v36, %v1275_v37 }
 0x5ca   : > { %v1277_v40 = vmul.f32 0.5, %v1276_v38 }
 0x5cc   : > { %v1278_v41 = vsub.f32 1.5, %v1277_v40 }
 0x5ce   : > { %v1279_v42 = vmul.f32 %v2729_v36, %v1278_v41 }
 0x5d0   : > { %v1283_v44 = vsel %vm1282_vm9, %v2729_v36, %v1279_v42 }
 0x5d1   : > { %v1284_v46 = vmul.f32 %v1283_v44, %v1267_v27 }
 0x5d3   : > { %v1286_v47 = vmul.f32 %v1285_v43, %v1284_v46 }
 0x5d5   : > { %v1288_v48 = vadd.f32 %v1287_v45, %v1286_v47 }
 0x5d7   : > { %v1289_v49 = vpack.c.bf16 %v1288_v48, %v1288_v48 }
 0x5d9   : > { %2512 = vmatmul.msk.bf16.vlgmr.msra.gmra.mxu3 %vm459_vm0, %v1289_v49 }
 0x65c   : > { %v1322_v52 = vpop.f32.mrf.mxu3 }
 0x65d   : > { %v1323_v53 = vadd.f32 %v2706_v10, %v1322_v52 }
 0x65f   : > { %v1326_v54 = vmax.f32 %v1323_v53, 0.0 }
 0x661   : > { %v1327_v55 = vpack.c.bf16 %v1326_v54, %v1326_v54 }
 0x663   : > { %2529 = vmatmul.msk.bf16.vlgmr.msrb.gmra.mxu0 %vm1361_vm10, %v1327_v55 }
 0x664   : > { %v1324_v15 = vpop.f32.mrf.mxu3 }
 0x6e0   : > { %v1374_v57 = vpop.f32.mrf.mxu0 }
 0x6e1   : > { %v1375_v17 = vadd.f32 %v1374_v57, %v1336_v56 }
 0x6e3   : > { %v1378_v58 = vadd.f32 %v1375_v17, %v1288_v48 }
 0x6e5   : > { %v1379_v59 = vsel %vm459_vm0, %v1378_v58, 0.0 }
 0x6e6   : > { %1380 = vadd.xlane.f32.xlu1 %v1379_v59 }
 0x6e8   : > { %v1376_v60 = vpop.f32.mrf.mxu0 }
 0x759   : > { %v1381_v61 = vpop.xlane.xlu1 %1380 }
 0x75a   : > { %v1382_v62 = vmul.f32 %v1381_v61, %v3198_v22 }
 0x75c   : > { %v1383_v63 = vsub.f32 %v1378_v58, %v1382_v62 }
 0x75e   : > { %v1384_v23 = vmul.f32 %v1383_v63, %v1383_v63 }
 0x760   : > { %v1385_v0 = vsel %vm459_vm0, %v1384_v23, 0.0 }
 0x761   : > { %1386 = vadd.xlane.f32.xlu2 %v1385_v0 }
 0x7d4   : > { %v1387_v7 = vpop.xlane.xlu2 %1386 }
 0x7d5   : > { %v1388_v8 = vmul.f32 %v1387_v7, %v3198_v22 }
 0x7d7   : > { %v1389_v9 = vadd.f32 1e-05, %v1388_v8 }
 0x7d9   : > { %2730 = vrsqrt.f32 %v1389_v9  ;;  %vm1396_vm12 = vweird.f32 %v1389_v9 }
 0x7df   : > { %v2731_v11 = vpop.eup %2730 }
 0x7e0   : > { %v1391_v12 = vmul.f32 %v2731_v11, %v1389_v9  ;;  %vm1397_vm11 = vweird.f32 %v2731_v11 }
 0x7e1   : > { %vm1398_vm13 = vmor %vm1396_vm12, %vm1397_vm11 }
 0x7e2   : > { %v1392_v13 = vmul.f32 %v2731_v11, %v1391_v12 }
 0x7e4   : > { %v1393_v14 = vmul.f32 0.5, %v1392_v13 }
 0x7e6   : > { %v1394_v16 = vsub.f32 1.5, %v1393_v14 }
 0x7e8   : > { %v1395_v18 = vmul.f32 %v2731_v11, %v1394_v16 }
 0x7ea   : > { %v1399_v20 = vsel %vm1398_vm13, %v2731_v11, %v1395_v18 }
 0x7eb   : > { %v1400_v25 = vmul.f32 %v1399_v20, %v1383_v63 }
 0x7ed   : > { %v1402_v26 = vmul.f32 %v1401_v19, %v1400_v25 }
 0x7ef   : > { %v3244_v27 = vadd.f32 %v1403_v21, %v1402_v26 }
 0x7f1   : > { %v1447_v28 = vpack.c.bf16 %v3244_v27, %v3244_v27  ;;  %v1407_v29 = vadd.f32 %v2752_v1, %v3244_v27 }
 0x7f3   : > { %2557 = vmatmul.msk.bf16.vlgmr.msrb.gmra.mxu2 %vm459_vm0, %v1447_v28  ;;  %v1408_v30 = vpack.c.bf16 %v1407_v29, %v1407_v29 }
 0x7f5   : > { %2543 = vmatmul.msk.bf16.vlgmr.msrb.gmra.mxu1 %vm459_vm0, %v1408_v30 }
 0x872   : > { %v1443_v32 = vpop.f32.mrf.mxu1 }
 0x873   : > { %v1444_v33 = vadd.f32 %v2707_v31, %v1443_v32 }
 0x875   : > { %1493 = vrot.lane.b32.xlu2 %v1444_v33, %s2833_s25  ;;  %1490 = vrot.lane.b32.xlu1 %v1444_v33, %s2835_s27  ;;  %v1498_v44 = vrot.slane %v1444_v33, 4 }
 0x876   : > { %1487 = vrot.lane.b32.xlu0 %v1444_v33, %s2834_s26  ;;  %v3255_v6 = vpop.f32.mrf.mxu2 }
 0x87a   : > { %v1445_v34 = vpop.f32.mrf.mxu1 }
 0x87e   : > { %v1484_v35 = vpop.f32.mrf.mxu2 }
 0x8cf   : > { %v1494_v36 = vpop.permute.xlu2 %1493 }
 0x8d0   : > { %v1508_v47 = vrot.slane %v1494_v36, 4 }
 0x8e7   : > { %v1491_v37 = vpop.permute.xlu1 %1490 }
 0x8e8   : > { %v2699_v38 = vpack.i.bf16 %v1494_v36, %v1491_v37  ;;  %v1488_v40 = vpop.permute.xlu0 %1487  ;;  %v1496_v42 = vrot.slane %v1491_v37, 4  ;;  %v1499_v45 = vsel %vm524_vm1, %v1491_v37, %v1498_v44 }
 0x8e9   : > { %v2694_v41 = vpack.i.bf16 %v1488_v40, %v1444_v33  ;;  %v1510_v46 = vrot.slane %v1488_v40, 4  ;;  %v1507_v49 = vperm.slane %v1499_v45, %v2968_v24  ;;  %v1509_v50 = vsel %vm524_vm1, %v1508_v47, %v1488_v40 }
 0x8ea   : > { %2700 = vrot.lane.b32.xlu1 %v2699_v38, %s2836_s28  ;;  %v1497_v43 = vsel %vm524_vm1, %v1496_v42, %v1444_v33  ;;  %v1515_v52 = vperm.slane %v1509_v50, %v2968_v24 }
 0x8eb   : > { %2695 = vrot.lane.b32.xlu0 %v2694_v41, %s2836_s28  ;;  %v1503_v48 = vperm.slane %v1497_v43, %v2968_v24  ;;  %v1511_v51 = vsel %vm524_vm1, %v1494_v36, %v1510_v46  ;;  %v1534_v53 = vrot.slane %v1507_v49, 4 }
 0x8ec   : > { %v1519_v54 = vperm.slane %v1511_v51, %v2968_v24  ;;  %v1520_v15 = vrot.slane %v1515_v52, 4 }
 0x8ed   : > { %v1522_v10 = vrot.slane %v1503_v48, 4 }
 0x8ee   : > { %v1532_v56 = vrot.slane %v1519_v54, 4  ;;  %v1535_v57 = vsel %vm524_vm1, %v1519_v54, %v1534_v53  ;;  %v1521_v58 = vsel %vm524_vm1, %v1520_v15, %v1503_v48 }
 0x8ef   : > { %v1523_v55 = vsel %vm524_vm1, %v1515_v52, %v1522_v10  ;;  %v1543_v59 = vperm.slane %v1535_v57, %v2979_v39  ;;  %v1527_v62 = vperm.slane %v1521_v58, %v2979_v39 }
 0x8f0   : > { %v1531_v17 = vperm.slane %v1523_v55, %v2979_v39  ;;  %v1533_v60 = vsel %vm524_vm1, %v1532_v56, %v1507_v49 }
 0x8f1   : > { %v1539_v63 = vperm.slane %v1533_v60, %v2979_v39  ;;  %v1550_v23 = vrot.slane %v1543_v59, 4  ;;  %v1544_v9 = vrot.slane %v1527_v62, 4 }
 0x8f2   : > { %v1546_v61 = vrot.slane %v1531_v17, 4 }
 0x8f3   : > { %v1548_v13 = vrot.slane %v1539_v63, 4  ;;  %v1551_v14 = vsel %vm524_vm1, 0.0, %v1550_v23  ;;  %v1545_v32 = vsel %vm524_vm1, 0.0, %v1544_v9  ;;  %v1563_v33 = vsel %vm524_vm1, %v1550_v23, %v1539_v63 }
 0x8f4   : > { %v1547_v5 = vsel %vm524_vm1, 0.0, %v1546_v61  ;;  %v1552_v19 = vsel %vm524_vm1, %v1546_v61, %v1527_v62  ;;  %v1568_v37 = vrot.slane %v1551_v14, 4  ;;  %v1567_v54 = vperm.slane %v1563_v33, %v2968_v24 }
 0x8f5   : > { %v1557_v20 = vrot.slane %v1547_v5, 4  ;;  %v1556_v36 = vperm.slane %v1552_v19, %v2968_v24  ;;  %v1549_v42 = vsel %vm524_vm1, 0.0, %v1548_v13 }
 0x8f6   : > { %v1569_v51 = vsel %vm524_vm1, %v1568_v37, %v1549_v42 }
 0x8f7   : > { %v1558_v41 = vsel %vm524_vm1, %v1557_v20, %v1545_v32  ;;  %v1576_v56 = vrot.slane %v1556_v36, 4  ;;  %v1573_v58 = vperm.slane %v1569_v51, %v2968_v24 }
 0x8f8   : > { %v1562_v53 = vperm.slane %v1558_v41, %v2968_v24 }
 0x8f9   : > { %v1586_v14 = vrot.slane %v1573_v58, 4 }
 0x8fa   : > { %v1577_v13 = vsel %vm524_vm1, %v1562_v53, %v1576_v56 }
 0x8fb   : > { %v1587_v33 = vsel %vm524_vm1, %v1586_v14, %v1567_v54 }
 0x95c   : > { %v2701_v0 = vpop.permute.xlu1 %2700 }
 0x95d   : > { %v2703_v2 = vunpack.i.h.bf16 %v2701_v0  ;;  %v2702_v3 = vunpack.i.l.bf16 %v2701_v0  ;;  %v2696_v4 = vpop.permute.xlu0 %2695 }
 0x95e   : > { %v2698_v7 = vunpack.i.h.bf16 %v2696_v4  ;;  %v2697_v8 = vunpack.i.l.bf16 %v2696_v4 }
 0x95f   : > { %v1634_v11 = vrot.slane %v2703_v2, 4  ;;  %v1622_v12 = vrot.slane %v2702_v3, 4 }
 0x960   : > { %v1636_v16 = vrot.slane %v2698_v7, 4  ;;  %v1624_v18 = vrot.slane %v2697_v8, 4 }
 0x961   : > { %v1635_v21 = vsel %vm524_vm1, %v1634_v11, %v2698_v7  ;;  %v1623_v25 = vsel %vm524_vm1, %v1622_v12, %v2697_v8 }
 0x962   : > { %v1637_v26 = vsel %vm524_vm1, %v2703_v2, %v1636_v16  ;;  %v1641_v28 = vperm.slane %v1635_v21, %v2968_v24  ;;  %v1625_v1 = vsel %vm524_vm1, %v2702_v3, %v1624_v18  ;;  %v1629_v29 = vperm.slane %v1623_v25, %v2968_v24 }
 0x963   : > { %v1645_v30 = vperm.slane %v1637_v26, %v2968_v24  ;;  %v1633_v31 = vperm.slane %v1625_v1, %v2968_v24  ;;  %v1574_v2 = vrot.slane %v1562_v53, 4  ;;  %v1588_v3 = vrot.slane %v1567_v54, 4 }
 0x964   : > { %v1646_v34 = vrot.slane %v1641_v28, 4  ;;  %v1648_v35 = vrot.slane %v1629_v29, 4  ;;  %v1585_v1 = vperm.slane %v1577_v13, %v2979_v39 }
 0x965   : > { %v1658_v38 = vrot.slane %v1645_v30, 4  ;;  %v1660_v40 = vrot.slane %v1633_v31, 4  ;;  %v1589_v25 = vsel %vm524_vm1, %v1573_v58, %v1588_v3 }
 0x966   : > { %v1647_v43 = vsel %vm524_vm1, %v1646_v34, %v1629_v29  ;;  %v1649_v44 = vsel %vm524_vm1, %v1641_v28, %v1648_v35  ;;  %v1575_v29 = vsel %vm524_vm1, %v1574_v2, %v1556_v36  ;;  %v1597_v37 = vperm.slane %v1589_v25, %v2979_v39 }
 0x967   : > { %v1653_v45 = vperm.slane %v1647_v43, %v2979_v39  ;;  %v1657_v46 = vperm.slane %v1649_v44, %v2979_v39  ;;  %v1659_v47 = vsel %vm524_vm1, %v1658_v38, %v1633_v31  ;;  %v1661_v48 = vsel %vm524_vm1, %v1645_v30, %v1660_v40 }
 0x968   : > { %v1665_v49 = vperm.slane %v1659_v47, %v2979_v39  ;;  %v1669_v50 = vperm.slane %v1661_v48, %v2979_v39  ;;  %v1581_v41 = vperm.slane %v1575_v29, %v2979_v39  ;;  %v1593_v44 = vperm.slane %v1587_v33, %v2979_v39 }
 0x969   : > { %v1670_v10 = vrot.slane %v1653_v45, 4  ;;  %v1672_v52 = vrot.slane %v1657_v46, 4  ;;  %v1604_v47 = vrot.slane %v1585_v1, 4  ;;  %v1602_v51 = vrot.slane %v1597_v37, 4 }
 0x96a   : > { %v1674_v55 = vrot.slane %v1665_v49, 4  ;;  %v1676_v15 = vrot.slane %v1669_v50, 4  ;;  %v1600_v53 = vrot.slane %v1581_v41, 4 }
 0x96b   : > { %v1673_v57 = vsel %vm524_vm1, 0.0, %v1672_v52  ;;  %v1678_v17 = vsel %vm524_vm1, %v1672_v52, %v1653_v45  ;;  %v1671_v62 = vsel %vm524_vm1, 0.0, %v1670_v10  ;;  %v1605_v56 = vsel %vm524_vm1, %v1597_v37, %v1604_v47 }
 0x96c   : > { %v1677_v59 = vsel %vm524_vm1, 0.0, %v1676_v15  ;;  %v1683_v60 = vrot.slane %v1673_v57, 4  ;;  %v1689_v61 = vsel %vm524_vm1, %v1676_v15, %v1665_v49  ;;  %v1682_v23 = vperm.slane %v1678_v17, %v2968_v24 }
 0x96d   : > { %v1694_v63 = vrot.slane %v1677_v59, 4  ;;  %v1693_v0 = vperm.slane %v1689_v61, %v2968_v24  ;;  %v1675_v4 = vsel %vm524_vm1, 0.0, %v1674_v55  ;;  %v1598_v55 = vrot.slane %v1593_v44, 4 }
 0x96e   : > { %v1684_v5 = vsel %vm524_vm1, %v1683_v60, %v1671_v62  ;;  %v1702_v9 = vrot.slane %v1682_v23, 4  ;;  %v1603_v57 = vsel %vm524_vm1, %v1602_v51, %v1585_v1  ;;  %v1601_v17 = vsel %vm524_vm1, %v1593_v44, %v1600_v53 }
 0x96f   : > { %v1688_v7 = vperm.slane %v1684_v5, %v2968_v24  ;;  %v1695_v8 = vsel %vm524_vm1, %v1694_v63, %v1675_v4  ;;  %v1714_v11 = vrot.slane %v1693_v0, 4  ;;  %v1609_v58 = vpack.c.bf16 %v1605_v56, %v1605_v56 }
 0x970   : > { %v1699_v12 = vperm.slane %v1695_v8, %v2968_v24  ;;  %v1599_v59 = vsel %vm524_vm1, %v1598_v55, %v1581_v41  ;;  %v1608_v60 = vpack.c.bf16 %v1603_v57, %v1603_v57  ;;  %v1607_v61 = vpack.c.bf16 %v1601_v17, %v1601_v17 }
 0x971   : > { %v1703_v16 = vsel %vm524_vm1, %v1688_v7, %v1702_v9  ;;  %v1700_v18 = vrot.slane %v1688_v7, 4  ;;  %v1606_v62 = vpack.c.bf16 %v1599_v59, %v1599_v59 }
 0x972   : > { %v1711_v19 = vperm.slane %v1703_v16, %v2979_v39  ;;  %v1715_v20 = vsel %vm524_vm1, %v1699_v12, %v1714_v11  ;;  %v1712_v21 = vrot.slane %v1699_v12, 4 }
 0x973   : > { %v1723_v26 = vperm.slane %v1715_v20, %v2979_v39  ;;  %v1701_v28 = vsel %vm524_vm1, %v1700_v18, %v1682_v23 }
 0x974   : > { %v1730_v30 = vrot.slane %v1711_v19, 4  ;;  %v1707_v31 = vperm.slane %v1701_v28, %v2979_v39  ;;  %v1713_v32 = vsel %vm524_vm1, %v1712_v21, %v1693_v0 }
 0x975   : > { %v1728_v34 = vrot.slane %v1723_v26, 4  ;;  %v1719_v35 = vperm.slane %v1713_v32, %v2979_v39 }
 0x976   : > { %v1731_v38 = vsel %vm524_vm1, %v1723_v26, %v1730_v30  ;;  %v1726_v40 = vrot.slane %v1707_v31, 4 }
 0x977   : > { %v1729_v42 = vsel %vm524_vm1, %v1728_v34, %v1711_v19  ;;  %v1735_v36 = vpack.c.bf16 %v1731_v38, %v1731_v38  ;;  %v1724_v43 = vrot.slane %v1719_v35, 4  ;;  %v2708_v19 = vld [vmem:[%s3532_s5 + $0x1] ss:$0 sm:$0xff] }
 0x978   : > { %v1734_v45 = vpack.c.bf16 %v1729_v42, %v1729_v42  ;;  %v1727_v46 = vsel %vm524_vm1, %v1719_v35, %v1726_v40  ;;  %v1483_v20 = vadd.f32 %v2708_v19, %v3255_v6 }
 0x979   : > { %v1921_v48 = vsel %vm888_vm2, %v1735_v36, 0  ;;  %v1725_v49 = vsel %vm524_vm1, %v1724_v43, %v1707_v31  ;;  %v1733_v50 = vpack.c.bf16 %v1727_v46, %v1727_v46 }
 0x97a   : > { %v1902_v10 = vsel %vm888_vm2, %v1734_v45, 0  ;;  %1930 = vmatpush.bf16.xpose.msra.mxu2 %v1921_v48  ;;  %v1732_v52 = vpack.c.bf16 %v1725_v49, %v1725_v49  ;;  %v1748_v36 = vrot.slane %v1483_v20, 4 }
 0x97b   : > { %1911 = vmatpush.bf16.xpose.msra.mxu1 %v1902_v10  ;;  %v1883_v54 = vsel %vm888_vm2, %v1733_v50, 0 }
 0x97c   : > { %v1864_v15 = vsel %vm888_vm2, %v1732_v52, 0  ;;  %1892 = vmatpush.bf16.xpose.msra.mxu0 %v1883_v54 }
 0x97d   : > { %1873 = vmatpush.bf16.xpose.msrb.mxu3 %v1864_v15 }
 0x981   : > { %2561 = vmatmul.msk.bf16.vlgmr.msra.gmra.mxu2 %vm888_vm2, %v1609_v58 }
 0x982   : > { %2560 = vmatmul.msk.bf16.vlgmr.msra.gmra.mxu1 %vm888_vm2, %v1608_v60 }
 0x983   : > { %2559 = vmatmul.msk.bf16.vlgmr.msra.gmra.mxu0 %vm888_vm2, %v1607_v61 }
 0x984   : > { %2558 = vmatmul.msk.bf16.vlgmr.msrb.gmra.mxu3 %vm888_vm2, %v1606_v62 }
 0x9ff   : > { %v1913_v63 = vpop.f32.mrf.mxu1 }
 0xa00   : > { %v1938_v23 = vmul.f32 0.35355338, %v1913_v63  ;;  %v1894_v0 = vpop.f32.mrf.mxu0 }
 0xa01   : > { %v1937_v2 = vmul.f32 0.35355338, %v1894_v0 }
 0xa02   : > { %v1946_v3 = vsel %vm888_vm2, %v1938_v23, -inf }
 0xa03   : > { %1947 = vmax.xlane.f32.xlu1 %v1946_v3  ;;  %v1943_v4 = vsel %vm888_vm2, %v1937_v2, -inf }
 0xa04   : > { %v1932_v5 = vpop.f32.mrf.mxu2  ;;  %1944 = vmax.xlane.f32.xlu0 %v1943_v4 }
 0xa05   : > { %v1939_v7 = vmul.f32 0.35355338, %v1932_v5 }
 0xa07   : > { %v1875_v8 = vpop.f32.mrf.mxu3  ;;  %v1915_v9 = vpop.f32.mrf.mxu1  ;;  %v1949_v11 = vsel %vm888_vm2, %v1939_v7, -inf }
 0xa08   : > { %v1936_v12 = vmul.f32 0.35355338, %v1875_v8  ;;  %1950 = vmax.xlane.f32.xlu2 %v1949_v11  ;;  %v1896_v13 = vpop.f32.mrf.mxu0 }
 0xa0a   : > { %v1940_v14 = vsel %vm888_vm2, %v1936_v12, -inf }
 0xa0c   : > { %v1934_v16 = vpop.f32.mrf.mxu2  ;;  %1941 = vmax.xlane.f32.xlu0 %v1940_v14 }
 0xa0f   : > { %v1877_v18 = vpop.f32.mrf.mxu3 }
 0xa1c   : > { %1740 = vrot.lane.b32.xlu1 %v1483_v20, %s2835_s27 }
 0xa20   : > { %1737 = vrot.lane.b32.xlu2 %v1483_v20, %s2834_s26  ;;  %1743 = vrot.lane.b32.xlu0 %v1483_v20, %s2833_s25 }
 0xa76   : > { %v1948_v21 = vpop.xlane.xlu1 %1947 }
 0xa77   : > { %v1954_v25 = vsub.f32 %v1938_v23, %v1948_v21  ;;  %v1945_v26 = vpop.xlane.xlu0 %1944 }
 0xa78   : > { %v1953_v6 = vsub.f32 %v1937_v2, %v1945_v26 }
 0xa79   : > { %v1960_v28 = vmul.f32 1.442695, %v1954_v25 }
 0xa7a   : > { %v1958_v38 = vmul.f32 1.442695, %v1953_v6 }
 0xa7b   : > { %2732 = vpow2.f32 %v1960_v28  ;;  %v1951_v1 = vpop.xlane.xlu2 %1950 }
 0xa7c   : > { %v1955_v29 = vsub.f32 %v1939_v7, %v1951_v1 }
 0xa7e   : > { %v1962_v30 = vmul.f32 1.442695, %v1955_v29 }
 0xa7f   : > { %v1942_v31 = vpop.xlane.xlu0 %1941 }
 0xa80   : > { %2734 = vpow2.f32 %v1962_v30  ;;  %v1952_v32 = vsub.f32 %v1936_v12, %v1942_v31 }
 0xa81   : > { %v3358_v33 = vpop.eup %2732 }
 0xa82   : > { %v1956_v34 = vmul.f32 1.442695, %v1952_v32  ;;  %v1970_v35 = vsel %vm888_vm2, %v3358_v33, 0.0 }
 0xa83   : > { %1971 = vadd.xlane.f32.xlu1 %v1970_v35  ;;  %v1738_v43 = vpop.permute.xlu2 %1737 }
 0xa84   : > { %2736 = vpow2.f32 %v1956_v34  ;;  %v1760_v49 = vrot.slane %v1738_v43, 4 }
 0xa85   : > { %2738 = vpow2.f32 %v1958_v38 }
 0xa86   : > { %v3362_v37 = vpop.eup %2734 }
 0xa87   : > { %v1973_v40 = vsel %vm888_vm2, %v3362_v37, 0.0 }
 0xa88   : > { %1974 = vadd.xlane.f32.xlu0 %v1973_v40 }
 0xa8a   : > { %v3366_v41 = vpop.eup %2736 }
 0xa8b   : > { %v1964_v42 = vsel %vm888_vm2, %v3366_v41, 0.0  ;;  %v3371_v47 = vpop.eup %2738 }
 0xa8c   : > { %1965 = vadd.xlane.f32.xlu2 %v1964_v42  ;;  %v1967_v54 = vsel %vm888_vm2, %v3371_v47, 0.0 }
 0xa8e   : > { %v1741_v44 = vpop.permute.xlu1 %1740 }
 0xa8f   : > { %v1746_v45 = vrot.slane %v1741_v44, 4  ;;  %v1749_v46 = vsel %vm524_vm1, %v1741_v44, %v1748_v36 }
 0xa90   : > { %v1757_v48 = vperm.slane %v1749_v46, %v2968_v24 }
 0xa91   : > { %v1747_v50 = vsel %vm524_vm1, %v1746_v45, %v1483_v20 }
 0xa92   : > { %v1753_v51 = vperm.slane %v1747_v50, %v2968_v24  ;;  %v1744_v10 = vpop.permute.xlu0 %1743  ;;  %v1784_v55 = vrot.slane %v1757_v48, 4 }
 0xa93   : > { %v1758_v52 = vrot.slane %v1744_v10, 4  ;;  %v1761_v53 = vsel %vm524_vm1, %v1744_v10, %v1760_v49 }
 0xa94   : > { %v1769_v15 = vperm.slane %v1761_v53, %v2968_v24  ;;  %1968 = vadd.xlane.f32.xlu2 %v1967_v54  ;;  %v1772_v57 = vrot.slane %v1753_v51, 4 }
 0xa95   : > { %v1759_v56 = vsel %vm524_vm1, %v1758_v52, %v1738_v43 }
 0xa96   : > { %v1765_v17 = vperm.slane %v1759_v56, %v2968_v24  ;;  %v1782_v58 = vrot.slane %v1769_v15, 4  ;;  %v1785_v59 = vsel %vm524_vm1, %v1769_v15, %v1784_v55 }
 0xa97   : > { %v1793_v60 = vperm.slane %v1785_v59, %v2979_v39 }
 0xa98   : > { %v1770_v61 = vrot.slane %v1765_v17, 4  ;;  %v1773_v62 = vsel %vm524_vm1, %v1765_v17, %v1772_v57  ;;  %v1783_v63 = vsel %vm524_vm1, %v1782_v58, %v1757_v48 }
 0xa99   : > { %v1781_v23 = vperm.slane %v1773_v62, %v2979_v39  ;;  %v1789_v0 = vperm.slane %v1783_v63, %v2979_v39  ;;  %v1800_v2 = vrot.slane %v1793_v60, 4 }
 0xa9a   : > { %v1771_v3 = vsel %vm524_vm1, %v1770_v61, %v1753_v51 }
 0xa9b   : > { %v1777_v4 = vperm.slane %v1771_v3, %v2979_v39  ;;  %v1796_v5 = vrot.slane %v1781_v23, 4  ;;  %v1798_v7 = vrot.slane %v1789_v0, 4  ;;  %v1801_v8 = vsel %vm524_vm1, 0.0, %v1800_v2 }
 0xa9c   : > { %v1813_v9 = vsel %vm524_vm1, %v1800_v2, %v1789_v0  ;;  %v1818_v11 = vrot.slane %v1801_v8, 4 }
 0xa9d   : > { %v1794_v12 = vrot.slane %v1777_v4, 4  ;;  %v1797_v13 = vsel %vm524_vm1, 0.0, %v1796_v5  ;;  %v1799_v14 = vsel %vm524_vm1, 0.0, %v1798_v7  ;;  %v1802_v16 = vsel %vm524_vm1, %v1796_v5, %v1777_v4 }
 0xa9e   : > { %v1807_v18 = vrot.slane %v1797_v13, 4  ;;  %v1817_v19 = vperm.slane %v1813_v9, %v2968_v24  ;;  %v1819_v20 = vsel %vm524_vm1, %v1818_v11, %v1799_v14  ;;  %v1806_v21 = vperm.slane %v1802_v16, %v2968_v24 }
 0xa9f   : > { %v1795_v25 = vsel %vm524_vm1, 0.0, %v1794_v12  ;;  %v1823_v26 = vperm.slane %v1819_v20, %v2968_v24 }
 0xaa0   : > { %v1838_v28 = vrot.slane %v1817_v19, 4  ;;  %v1808_v1 = vsel %vm524_vm1, %v1807_v18, %v1795_v25  ;;  %v1826_v29 = vrot.slane %v1806_v21, 4 }
 0xaa1   : > { %v1812_v30 = vperm.slane %v1808_v1, %v2968_v24  ;;  %v1836_v31 = vrot.slane %v1823_v26, 4 }
 0xaa2   : > { %v1839_v32 = vsel %vm524_vm1, %v1823_v26, %v1838_v28 }
 0xaa3   : > { %v1827_v6 = vsel %vm524_vm1, %v1812_v30, %v1826_v29  ;;  %v1847_v34 = vperm.slane %v1839_v32, %v2979_v39  ;;  %v1824_v35 = vrot.slane %v1812_v30, 4  ;;  %v1837_v38 = vsel %vm524_vm1, %v1836_v31, %v1817_v19 }
 0xaa4   : > { %v1835_v40 = vperm.slane %v1827_v6, %v2979_v39  ;;  %v1843_v42 = vperm.slane %v1837_v38, %v2979_v39 }
 0xaa5   : > { %v1852_v36 = vrot.slane %v1847_v34, 4  ;;  %v1825_v43 = vsel %vm524_vm1, %v1824_v35, %v1806_v21 }
 0xaa6   : > { %v1831_v44 = vperm.slane %v1825_v43, %v2979_v39  ;;  %v1848_v45 = vrot.slane %v1843_v42, 4  ;;  %v1854_v46 = vrot.slane %v1835_v40, 4 }
 0xaa7   : > { %v1853_v48 = vsel %vm524_vm1, %v1852_v36, %v1835_v40 }
 0xaa8   : > { %v1858_v49 = vpack.c.bf16 %v1853_v48, %v1853_v48  ;;  %v1849_v50 = vsel %vm524_vm1, %v1848_v45, %v1831_v44  ;;  %v1855_v51 = vsel %vm524_vm1, %v1847_v34, %v1854_v46  ;;  %v1850_v10 = vrot.slane %v1831_v44, 4 }
 0xaa9   : > { %v1856_v52 = vpack.c.bf16 %v1849_v50, %v1849_v50  ;;  %v1859_v53 = vpack.c.bf16 %v1855_v51, %v1855_v51 }
 0xaaa   : > { %v2030_v54 = vsel %vm1020_vm3, %v1858_v49, 0  ;;  %v1851_v55 = vsel %vm524_vm1, %v1843_v42, %v1850_v10 }
 0xaab   : > { %2039 = vmatpush.bf16.msrb.mxu1 %v2030_v54  ;;  %v1992_v15 = vsel %vm1020_vm3, %v1856_v52, 0  ;;  %v2049_v56 = vsel %vm1020_vm3, %v1859_v53, 0  ;;  %v1857_v57 = vpack.c.bf16 %v1851_v55, %v1851_v55 }
 0xaac   : > { %2001 = vmatpush.bf16.msra.mxu3 %v1992_v15  ;;  %2058 = vmatpush.bf16.msrb.mxu2 %v2049_v56 }
 0xaad   : > { %v2011_v17 = vsel %vm1020_vm3, %v1857_v57, 0 }
 0xaae   : > { %2020 = vmatpush.bf16.msrb.mxu0 %v2011_v17 }
 0xaf6   : > { %v1972_v58 = vpop.xlane.xlu1 %1971 }
 0xaf7   : > { %2740 = vrcp.f32 %v1972_v58 }
 0xafb   : > { %v1975_v59 = vpop.xlane.xlu0 %1974 }
 0xafc   : > { %2742 = vrcp.f32 %v1975_v59 }
 0xafd   : > { %v2741_v60 = vpop.eup %2740 }
 0xafe   : > { %v1982_v61 = vmul.f32 %v2741_v60, %v3358_v33 }
 0xaff   : > { %v1966_v62 = vpop.xlane.xlu2 %1965 }
 0xb00   : > { %v1986_v63 = vpack.c.bf16 %v1982_v61, %v1982_v61  ;;  %2744 = vrcp.f32 %v1966_v62 }
 0xb02   : > { %v2743_v23 = vpop.eup %2742  ;;  %2564 = vmatmul.msk.bf16.vlgmr.msrb.gmra.mxu1 %vm888_vm2, %v1986_v63 }
 0xb03   : > { %v1983_v0 = vmul.f32 %v2743_v23, %v3362_v37 }
 0xb05   : > { %v1987_v2 = vpack.c.bf16 %v1983_v0, %v1983_v0 }
 0xb06   : > { %v2745_v3 = vpop.eup %2744 }
 0xb07   : > { %v1980_v4 = vmul.f32 %v2745_v3, %v3366_v41  ;;  %v1969_v5 = vpop.xlane.xlu2 %1968  ;;  %2565 = vmatmul.msk.bf16.vlgmr.msrb.gmra.mxu2 %vm888_vm2, %v1987_v2 }
 0xb08   : > { %2746 = vrcp.f32 %v1969_v5 }
 0xb09   : > { %v1984_v7 = vpack.c.bf16 %v1980_v4, %v1980_v4 }
 0xb0b   : > { %2562 = vmatmul.msk.bf16.vlgmr.msra.gmra.mxu3 %vm888_vm2, %v1984_v7 }
 0xb0e   : > { %v2747_v33 = vpop.eup %2746 }
 0xb0f   : > { %v1981_v8 = vmul.f32 %v2747_v33, %v3371_v47 }
 0xb11   : > { %v1985_v9 = vpack.c.bf16 %v1981_v8, %v1981_v8 }
 0xb13   : > { %2563 = vmatmul.msk.bf16.vlgmr.msrb.gmra.mxu0 %vm888_vm2, %v1985_v9 }
 0xb7f   : > { %v2041_v11 = vpop.f32.mrf.mxu1 }
 0xb80   : > { %v2064_v13 = vrot.slane %v2041_v11, 4 }
 0xb87   : > { %v2043_v12 = vpop.f32.mrf.mxu1 }
 0xb8a   : > { %v2060_v37 = vpop.f32.mrf.mxu2 }
 0xb8b   : > { %v2076_v16 = vrot.slane %v2060_v37, 4 }
 0xb8e   : > { %v2003_v14 = vpop.f32.mrf.mxu3 }
 0xb8f   : > { %v2065_v41 = vsel %vm524_vm1, %v2064_v13, %v2003_v14  ;;  %v2066_v18 = vrot.slane %v2003_v14, 4 }
 0xb90   : > { %v2071_v19 = vperm.slane %v2065_v41, %v2968_v24  ;;  %v2022_v20 = vpop.f32.mrf.mxu0 }
 0xb91   : > { %v2067_v21 = vsel %vm524_vm1, %v2041_v11, %v2066_v18  ;;  %v2077_v25 = vsel %vm524_vm1, %v2076_v16, %v2022_v20  ;;  %v2078_v47 = vrot.slane %v2022_v20, 4  ;;  %v2636_v20 = vld [vmem:[%s3533_s6 + $0x18] sm:$0xff] }
 0xb92   : > { %v2075_v26 = vperm.slane %v2067_v21, %v2968_v24  ;;  %v2090_v28 = vrot.slane %v2071_v19, 4  ;;  %v2083_v1 = vperm.slane %v2077_v25, %v2968_v24  ;;  %v2062_v29 = vpop.f32.mrf.mxu2  ;;  %2217 = vmatpush.bf16.msrb.mxu3 %v2636_v20 }
 0xb93   : > { %v2079_v30 = vsel %vm524_vm1, %v2060_v37, %v2078_v47 }
 0xb94   : > { %v2102_v31 = vrot.slane %v2075_v26, 4  ;;  %v2087_v32 = vperm.slane %v2079_v30, %v2968_v24  ;;  %v2088_v6 = vrot.slane %v2083_v1, 4  ;;  %v2091_v34 = vsel %vm524_vm1, %v2083_v1, %v2090_v28  ;;  %v3482_v30 = vld [vmem:[%s3536_s9 + $0x8] sm:$0x3f] }
 0xb95   : > { %v2099_v35 = vperm.slane %v2091_v34, %v2979_v39 }
 0xb96   : > { %v2089_v38 = vsel %vm524_vm1, %v2088_v6, %v2071_v19  ;;  %v2100_v40 = vrot.slane %v2087_v32, 4  ;;  %v2103_v42 = vsel %vm524_vm1, %v2087_v32, %v2102_v31  ;;  %v2005_v36 = vpop.f32.mrf.mxu3  ;;  %v2195_v31 = vperm.slane %v3482_v30, 0 }
 0xb97   : > { %v2095_v43 = vperm.slane %v2089_v38, %v2979_v39  ;;  %v2111_v44 = vperm.slane %v2103_v42, %v2979_v39  ;;  %v2114_v45 = vrot.slane %v2099_v35, 4 }
 0xb98   : > { %v2101_v46 = vsel %vm524_vm1, %v2100_v40, %v2075_v26  ;;  %v2024_v48 = vpop.f32.mrf.mxu0 }
 0xb99   : > { %v2107_v49 = vperm.slane %v2101_v46, %v2979_v39  ;;  %v2112_v50 = vrot.slane %v2095_v43, 4  ;;  %v2115_v51 = vsel %vm524_vm1, 0.0, %v2114_v45  ;;  %v2118_v10 = vrot.slane %v2111_v44, 4  ;;  %v2642_v46 = vld [vmem:[%s3535_s8 + $0x38] sm:$0xff] }
 0xb9a   : > { %v2120_v52 = vsel %vm524_vm1, %v2114_v45, %v2095_v43  ;;  %v2125_v53 = vrot.slane %v2115_v51, 4  ;;  %v2638_v45 = vld [vmem:[%s3534_s7 + $0x18] sm:$0xff]  ;;  %2333 = vmatpush.bf16.msra.mxu1 %v2642_v46 }
 0xb9b   : > { %v2113_v54 = vsel %vm524_vm1, 0.0, %v2112_v50  ;;  %v2116_v55 = vrot.slane %v2107_v49, 4  ;;  %v2119_v15 = vsel %vm524_vm1, 0.0, %v2118_v10  ;;  %v2124_v56 = vperm.slane %v2120_v52, %v2968_v24  ;;  %2283 = vmatpush.bf16.msra.mxu0 %v2638_v45  ;;  %v2641_v50 = vld [vmem:[%s3535_s8 + $0x30] sm:$0xff] }
 0xb9c   : > { %v2136_v57 = vrot.slane %v2119_v15, 4  ;;  %v2126_v17 = vsel %vm524_vm1, %v2125_v53, %v2113_v54  ;;  %v2131_v58 = vsel %vm524_vm1, %v2118_v10, %v2107_v49 }
 0xb9d   : > { %v2117_v59 = vsel %vm524_vm1, 0.0, %v2116_v55  ;;  %v2130_v60 = vperm.slane %v2126_v17, %v2968_v24  ;;  %v2135_v61 = vperm.slane %v2131_v58, %v2968_v24  ;;  %v2144_v62 = vrot.slane %v2124_v56, 4 }
 0xb9e   : > { %v2137_v63 = vsel %vm524_vm1, %v2136_v57, %v2117_v59  ;;  %2334 = vmatpush.bf16.msra.mxu1 %v2641_v50  ;;  %v2249_v17 = vperm.slane %v3482_v30, 3 }
 0xb9f   : > { %v2141_v23 = vperm.slane %v2137_v63, %v2968_v24  ;;  %v2145_v0 = vsel %vm524_vm1, %v2130_v60, %v2144_v62  ;;  %v2156_v2 = vrot.slane %v2135_v61, 4  ;;  %v2142_v3 = vrot.slane %v2130_v60, 4  ;;  %v2640_v62 = vld [vmem:[%s3535_s8 + $0x28] sm:$0xff]  ;;  %v2639_v63 = vld [vmem:[%s3535_s8 + $0x20] sm:$0xff] }
 0xba0   : > { %v2153_v4 = vperm.slane %v2145_v0, %v2979_v39 }
 0xba1   : > { %v2157_v5 = vsel %vm524_vm1, %v2141_v23, %v2156_v2  ;;  %v2143_v7 = vsel %vm524_vm1, %v2142_v3, %v2124_v56  ;;  %v2154_v33 = vrot.slane %v2141_v23, 4  ;;  %v2247_v56 = vperm.slane %v3482_v30, 2  ;;  %v2709_v23 = vld [vmem:[#allocation4 + $0x1] ss:$0 sm:$0xff] }
 0xba2   : > { %v2165_v8 = vperm.slane %v2157_v5, %v2979_v39  ;;  %v2172_v9 = vrot.slane %v2153_v4, 4  ;;  %v2149_v11 = vperm.slane %v2143_v7, %v2979_v39  ;;  %2335 = vmatpush.bf16.msra.mxu1 %v2640_v62  ;;  %v2301_v7 = vperm.slane %v3482_v30, 1 }
 0xba3   : > { %v2155_v12 = vsel %vm524_vm1, %v2154_v33, %v2135_v61 }
 0xba4   : > { %v2173_v24 = vsel %vm524_vm1, %v2165_v8, %v2172_v9  ;;  %v2170_v37 = vrot.slane %v2165_v8, 4  ;;  %v2161_v13 = vperm.slane %v2155_v12, %v2979_v39  ;;  %v2168_v14 = vrot.slane %v2149_v11, 4  ;;  %v2635_v39 = vld [vmem:[%s3533_s6 + $0x10] sm:$0xff] }
 0xba5   : > { %2183 = vrot.lane.b32.xlu1 %v2173_v24, %s2839_s18  ;;  %2218 = vmatpush.bf16.msrb.mxu3 %v2635_v39 }
 0xba6   : > { %v2171_v16 = vsel %vm524_vm1, %v2170_v37, %v2153_v4  ;;  %v2166_v41 = vrot.slane %v2161_v13, 4  ;;  %v2169_v18 = vsel %vm524_vm1, %v2161_v13, %v2168_v14  ;;  %2336 = vmatpush.bf16.msra.mxu1 %v2639_v63 }
 0xba7   : > { %2179 = vrot.lane.b32.xlu2 %v2171_v16, %s2840_s19  ;;  %2175 = vrot.lane.b32.xlu0 %v2169_v18, %s2841_s22 }
 0xba8   : > { %v2167_v19 = vsel %vm524_vm1, %v2166_v41, %v2149_v11 }
 0xc01   : > { %v2180_v25 = vpop.permute.xlu2 %2179 }
 0xc17   : > { %v2184_v26 = vpop.permute.xlu1 %2183 }
 0xc19   : > { %v2176_v21 = vpop.permute.xlu0 %2175 }
 0xc1a   : > { %v2186_v47 = vsel %vm888_vm2, %v2167_v19, %v2176_v21 }
 0xc1b   : > { %v2187_v28 = vsel %vm1217_vm4, %v2186_v47, %v2180_v25 }
 0xc1c   : > { %v2188_v1 = vsel %vm1219_vm5, %v2187_v28, %v2184_v26  ;;  %v2365_v28 = vperm.slane %v3482_v30, 4 }
 0xc1d   : > { %v2189_v29 = vpack.c.bf16 %v2188_v1, %v2188_v1 }
 0xc1f   : > { %2578 = vmatmul.msk.bf16.vlgmr.msrb.gmra.mxu3 %vm459_vm0, %v2189_v29  ;;  %v2367_v29 = vperm.slane %v3482_v30, 5 }
 0xca2   : > { %v2220_v32 = vpop.f32.mrf.mxu3 }
 0xca3   : > { %v2221_v6 = vadd.f32 %v2220_v32, %v2195_v31 }
 0xca5   : > { %v2224_v34 = vadd.f32 %v2221_v6, %v3244_v27  ;;  %v2637_v27 = vld [vmem:[%s3534_s7 + $0x10] sm:$0xff] }
 0xca6   : > { %2284 = vmatpush.bf16.msra.mxu0 %v2637_v27 }
 0xca7   : > { %v2225_v35 = vsel %vm459_vm0, %v2224_v34, 0.0 }
 0xca8   : > { %2226 = vadd.xlane.f32.xlu0 %v2225_v35 }
 0xcaa   : > { %v2222_v38 = vpop.f32.mrf.mxu3 }
 0xd1b   : > { %v2227_v40 = vpop.xlane.xlu0 %2226 }
 0xd1c   : > { %v2228_v42 = vmul.f32 %v2227_v40, %v3198_v22 }
 0xd1e   : > { %v2229_v36 = vsub.f32 %v2224_v34, %v2228_v42 }
 0xd20   : > { %v2230_v43 = vmul.f32 %v2229_v36, %v2229_v36 }
 0xd22   : > { %v2231_v44 = vsel %vm459_vm0, %v2230_v43, 0.0 }
 0xd23   : > { %2232 = vadd.xlane.f32.xlu2 %v2231_v44 }
 0xd96   : > { %v2233_v48 = vpop.xlane.xlu2 %2232 }
 0xd97   : > { %v2234_v49 = vmul.f32 %v2233_v48, %v3198_v22 }
 0xd99   : > { %v2235_v51 = vadd.f32 1e-05, %v2234_v49 }
 0xd9b   : > { %2748 = vrsqrt.f32 %v2235_v51  ;;  %vm2242_vm15 = vweird.f32 %v2235_v51 }
 0xda1   : > { %v2749_v10 = vpop.eup %2748 }
 0xda2   : > { %v2237_v52 = vmul.f32 %v2749_v10, %v2235_v51  ;;  %vm2243_vm14 = vweird.f32 %v2749_v10 }
 0xda3   : > { %vm2244_vm1 = vmor %vm2242_vm15, %vm2243_vm14 }
 0xda4   : > { %v2238_v53 = vmul.f32 %v2749_v10, %v2237_v52 }
 0xda6   : > { %v2239_v54 = vmul.f32 0.5, %v2238_v53 }
 0xda8   : > { %v2240_v55 = vsub.f32 1.5, %v2239_v54 }
 0xdaa   : > { %v2241_v15 = vmul.f32 %v2749_v10, %v2240_v55 }
 0xdac   : > { %v2245_v57 = vsel %vm2244_vm1, %v2749_v10, %v2241_v15 }
 0xdad   : > { %v2246_v58 = vmul.f32 %v2245_v57, %v2229_v36 }
 0xdaf   : > { %v2248_v59 = vmul.f32 %v2247_v56, %v2246_v58 }
 0xdb1   : > { %v2250_v60 = vadd.f32 %v2249_v17, %v2248_v59 }
 0xdb3   : > { %v2251_v61 = vpack.c.bf16 %v2250_v60, %v2250_v60 }
 0xdb5   : > { %2591 = vmatmul.msk.bf16.vlgmr.msra.gmra.mxu0 %vm459_vm0, %v2251_v61 }
 0xe32   : > { %v2286_v0 = vpop.f32.mrf.mxu0 }
 0xe33   : > { %v2287_v2 = vadd.f32 %v2709_v23, %v2286_v0 }
 0xe35   : > { %v2290_v3 = vmax.f32 %v2287_v2, 0.0 }
 0xe37   : > { %v2291_v4 = vpack.c.bf16 %v2290_v3, %v2290_v3 }
 0xe39   : > { %2616 = vmatmul.msk.bf16.vlgmr.msra.gmra.mxu1 %vm1361_vm10, %v2291_v4 }
 0xe3a   : > { %v2288_v5 = vpop.f32.mrf.mxu0 }
 0xeb6   : > { %v2338_v33 = vpop.f32.mrf.mxu1 }
 0xeb7   : > { %v2339_v8 = vadd.f32 %v2338_v33, %v2301_v7 }
 0xeb9   : > { %v2342_v9 = vadd.f32 %v2339_v8, %v2250_v60 }
 0xebb   : > { %v2343_v11 = vsel %vm459_vm0, %v2342_v9, 0.0 }
 0xebc   : > { %2344 = vadd.xlane.f32.xlu1 %v2343_v11 }
 0xebe   : > { %v2340_v12 = vpop.f32.mrf.mxu1 }
 0xf2f   : > { %v2345_v24 = vpop.xlane.xlu1 %2344 }
 0xf30   : > { %v2346_v37 = vmul.f32 %v2345_v24, %v3198_v22 }
 0xf32   : > { %v2347_v13 = vsub.f32 %v2342_v9, %v2346_v37 }
 0xf34   : > { %v2348_v14 = vmul.f32 %v2347_v13, %v2347_v13 }
 0xf36   : > { %v2349_v16 = vsel %vm459_vm0, %v2348_v14, 0.0 }
 0xf37   : > { %2350 = vadd.xlane.f32.xlu0 %v2349_v16 }
 0xfaa   : > { %v2351_v41 = vpop.xlane.xlu0 %2350 }
 0xfab   : > { %v2352_v18 = vmul.f32 %v2351_v41, %v3198_v22 }
 0xfad   : > { %v2353_v19 = vadd.f32 1e-05, %v2352_v18 }
 0xfaf   : > { %2750 = vrsqrt.f32 %v2353_v19  ;;  %vm2360_vm3 = vweird.f32 %v2353_v19 }
 0xfb5   : > { %v2751_v20 = vpop.eup %2750 }
 0xfb6   : > { %v2355_v39 = vmul.f32 %v2751_v20, %v2353_v19  ;;  %vm2361_vm2 = vweird.f32 %v2751_v20 }
 0xfb7   : > { %vm2362_vm4 = vmor %vm2360_vm3, %vm2361_vm2 }
 0xfb8   : > { %v2356_v21 = vmul.f32 %v2751_v20, %v2355_v39 }
 0xfba   : > { %v2357_v25 = vmul.f32 0.5, %v2356_v21 }
 0xfbc   : > { %v2358_v47 = vsub.f32 1.5, %v2357_v25 }
 0xfbe   : > { %v2359_v26 = vmul.f32 %v2751_v20, %v2358_v47 }
 0xfc0   : > { %v2363_v1 = vsel %vm2362_vm4, %v2751_v20, %v2359_v26 }
 0xfc1   : > { %v2364_v31 = vmul.f32 %v2363_v1, %v2347_v13 }
 0xfc3   : > { %v2366_v32 = vmul.f32 %v2365_v28, %v2364_v31 }
 0xfc5   : > { %v2368_v22 = vadd.f32 %v2367_v29, %v2366_v32 }
 0xfc7   : > { %2369 = vst.msk [vmem:[%s432_s16] sm:$0xff] %vm459_vm0, %v2368_v22 }
 0xfc8 PF: > { %s23_s17 = sadd.s32 1, %s2827_s17  }
 0xfc9   : > { %p20_p7 = scmp.ge.s32.totalorder %s23_s17, 4  }
 0xfcb   :  { %22 = sbr.rel (!%p20_p7) target bundleno = 2 (0x2), region = 115 }
 0xfd0   :  { %2389 = vsyncpa [#allocation3], 1 }
 0xfd1   :  { %2391 = vsyncpa [#allocation3 + $0x1], 1 }
 0xfd2   :  { %2392 = vsyncpa [#allocation5], 1 }

</bundles_post_ra>
